<compile_context>
chip_gen: v7x
topology: tpu7x:2x2x1
jax: 0.10.0
libtpu: 0.0.40
codegen_flags: <defaults>
</compile_context>

<pallas_src>
import functools

import numpy as np
import jax
import jax.numpy as jnp
from jax.experimental import pallas as pl
from jax.experimental.pallas import tpu as pltpu


def _round_up(v, m):
    return (v + m - 1) // m * m


def _cdiv(a, b):
    return -(-a // b)


def _build_mask_and_realign(H, W, Pp):
    """(49, P) validity mask and (49, P) gather columns.

    The kernel accumulates acc[s, q] = sum_m x[m, (q - sY*W) % Pp] *
    y[m, (q + sX) % Pp]; the final result is
    out[s, p] = acc[s, (p + sY*W) % Pp] * mask[s, p].
    """
    P = H * W
    idx = np.arange(P)
    rows, cols_w = idx // W, idx % W
    mask = np.zeros((49, P), np.float32)
    gcols = np.zeros((49, P), np.int32)
    for j in range(7):
        for i in range(7):
            sY, sX = j - 3, i - 3
            s = j * 7 + i
            valid = ((rows + sY >= 0) & (rows + sY < H)
                     & (cols_w + sX >= 0) & (cols_w + sX < W))
            mask[s] = valid.astype(np.float32)
            gcols[s] = (idx + sY * W) % Pp
    return mask, gcols


def _corr_kernel(x_ref, y_ref, o_ref, *, W):
    # x_ref, y_ref: (tm, Pp) slab of this core's half of the M=N*C reduction.
    # o_ref:        (49, Pp) per-core accumulator, resident across the m axis.
    m_idx = pl.program_id(1)

    @pl.when(m_idx == 0)
    def _init():
        o_ref[...] = jnp.zeros_like(o_ref)

    x = x_ref[...].astype(jnp.float32)   # (tm, Pp)
    y = y_ref[...].astype(jnp.float32)   # (tm, Pp)
    L = x.shape[-1]

    # 6 lane rolls of y (sX in [-3,3], identity skipped), shared across all sY.
    y_rolls = []
    for i in range(7):
        sh = (-(i - 3)) % L
        y_rolls.append(pltpu.roll(y, sh, axis=1) if sh else y)

    # Per sY: one roll of x by +sY*W, then 7 VPU multiply + sublane reductions.
    # Rows are accumulated *unaligned*; alignment is restored in the wrapper.
    rows = []
    for j in range(7):
        sh = ((j - 3) * W) % L
        xj = pltpu.roll(x, sh, axis=1) if sh else x
        for i in range(7):
            rows.append(jnp.sum(xj * y_rolls[i], axis=0, keepdims=True))

    # ONE dense (49, Pp) accumulator update per grid step.
    o_ref[...] += jnp.concatenate(rows, axis=0)


def correlation_layer(x, y):
    """x, y: (N, C, H, W) -> (1, 49, H, W) float32."""
    N, C, H, W = x.shape
    assert y.shape == x.shape
    M, P = N * C, H * W
    # Lane-dense pixel axis; skip padding when P is already 128-aligned.
    Pp = P if P % 128 == 0 else _round_up(P, 128)

    x2 = jnp.reshape(x, (M, P))
    y2 = jnp.reshape(y, (M, P))

    # M-slab size: cap so pipeline buffers (2 inputs x 2 buffers) plus the
    # ~10 live rolled copies of a (tm, Pp) f32 slab stay well inside v7x's
    # 64 MiB VMEM; then shrink tm so the per-core rows split evenly over the
    # grid (minimal zero-padding of M).
    tm_cap = max(8, min(256, ((32 << 20) // (64 * Pp)) // 8 * 8))
    Mh = _round_up(M, 16) // 2              # rows per core (multiple of 8)
    grid_half = max(1, _cdiv(Mh, tm_cap))
    tm = _round_up(_cdiv(Mh, grid_half), 8)
    Mp = 2 * grid_half * tm

    if Mp != M or Pp != P:
        # zero rows / zero lane-padding contribute nothing to the reduction
        x2 = jnp.pad(x2, ((0, Mp - M), (0, Pp - P)))
        y2 = jnp.pad(y2, ((0, Mp - M), (0, Pp - P)))

    # VMEM budget: ~16 slabs worth of (tm, Pp) f32 (pipeline buffers + rolled
    # copies + temporaries) + double-buffered (49, Pp) accumulator + headroom.
    vmem_limit = int(min(max(64 * Pp * tm + 8 * 49 * Pp + (8 << 20),
                             32 << 20), 48 << 20))

    acc2 = pl.pallas_call(
        functools.partial(_corr_kernel, W=W),
        out_shape=jax.ShapeDtypeStruct((2, 49, Pp), jnp.float32),
        grid_spec=pltpu.PrefetchScalarGridSpec(
            num_scalar_prefetch=0,
            grid=(2, grid_half),            # (core split of M, M slabs)
            in_specs=[
                pl.BlockSpec((tm, Pp), lambda g, m: (g * grid_half + m, 0)),
                pl.BlockSpec((tm, Pp), lambda g, m: (g * grid_half + m, 0)),
            ],
            out_specs=pl.BlockSpec((None, 49, Pp), lambda g, m: (g, 0, 0)),
        ),
        compiler_params=pltpu.CompilerParams(
            dimension_semantics=("parallel", "arbitrary"),
            vmem_limit_bytes=vmem_limit,
        ),
    )(x2, y2)

    acc = acc2[0] + acc2[1]                 # (49, Pp) sum of per-core partials

    # One-time realignment (undo the in-kernel x roll) + boundary mask.
    mask, gcols = _build_mask_and_realign(H, W, Pp)
    out = jnp.take_along_axis(acc, jnp.asarray(gcols), axis=1) * jnp.asarray(mask)
    return out.reshape(1, 49, H, W)


def _reference_correlation(x, y):
    """Pure numpy reference matching the PyTorch module exactly."""
    x = np.asarray(x, np.float32)
    y = np.asarray(y, np.float32)
    N, C, H, W = x.shape
    out = np.zeros((49, H, W), np.float32)
    for j in range(7):
        for i in range(7):
            sX = i - 3
            sY = j - 3
            for h in range(H):
                hh = h + sY
                if not (0 <= hh < H):
                    continue
                for w in range(W):
                    ww = w + sX
                    if not (0 <= ww < W):
                        continue
                    out[j * 7 + i, h, w] = np.sum(x[:, :, h, w] * y[:, :, hh, ww])
    return out[None]


if __name__ == "__main__":
    key = jax.random.PRNGKey(0)
    kx, ky = jax.random.split(key)
    N, C, H, W = 2, 4, 16, 16
    x = jax.random.normal(kx, (N, C, H, W), dtype=jnp.float32)
    y = jax.random.normal(ky, (N, C, H, W), dtype=jnp.float32)

    out = jax.block_until_ready(correlation_layer(x, y))

    ref = _reference_correlation(np.asarray(x), np.asarray(y))
    assert out.shape == (1, 49, H, W), out.shape
    np.testing.assert_allclose(np.asarray(out), ref, rtol=1e-5, atol=1e-5)
    print("KERNEL_OK")
</pallas_src>

<mosaic_0001>
module attributes {stable_mosaic.version = 11 : i64} {
  func.func @_corr_kernel(%arg0: i32, %arg1: i32, %arg2: memref<8x256xf32, #tpu.memory_space<vmem>>, %arg3: memref<8x256xf32, #tpu.memory_space<vmem>>, %arg4: memref<1x49x256xf32, #tpu.memory_space<vmem>>) attributes {dimension_semantics = [#tpu.dimension_semantics<parallel>, #tpu.dimension_semantics<arbitrary>], iteration_bounds = array<i64: 2, 1>, scalar_prefetch = 0 : i64, scratch_operands = 0 : i64, tpu.core_type = #tpu.core_type<tc>, window_params = [{transform_indices = @transform_0, window_bounds = array<i64: 8, 256>}, {transform_indices = @transform_1, window_bounds = array<i64: 8, 256>}, {transform_indices = @transform_2, window_bounds = array<i64: 1, 49, 256>}]} {
    %c0_i32 = arith.constant 0 : i32
    %0 = arith.cmpi eq, %arg1, %c0_i32 : i32
    %1 = arith.extui %0 : i1 to i32
    %c0_i32_0 = arith.constant 0 : i32
    %2 = arith.cmpi ne, %1, %c0_i32_0 : i32
    scf.if %2 {
      %cst_58 = arith.constant 0.000000e+00 : f32
      %174 = vector.broadcast %cst_58 : f32 to vector<49x256xf32>
      %c0_59 = arith.constant 0 : index
      %c0_60 = arith.constant 0 : index
      %c0_61 = arith.constant 0 : index
      %175 = vector.load %arg4[%c0_59, %c0_60, %c0_61] : memref<1x49x256xf32, #tpu.memory_space<vmem>>, vector<1x49x256xf32>
      %176 = vector.shape_cast %175 : vector<1x49x256xf32> to vector<49x256xf32>
      %177 = vector.shape_cast %174 : vector<49x256xf32> to vector<1x49x256xf32>
      tpu.vector_store %arg4[%c0_59, %c0_60, %c0_61], %177 {strides = array<i32>} : memref<1x49x256xf32, #tpu.memory_space<vmem>>, vector<1x49x256xf32>,
    } else {
    }
    %c0 = arith.constant 0 : index
    %c0_1 = arith.constant 0 : index
    %3 = vector.load %arg2[%c0, %c0_1] : memref<8x256xf32, #tpu.memory_space<vmem>>, vector<8x256xf32>
    %c0_2 = arith.constant 0 : index
    %c0_3 = arith.constant 0 : index
    %4 = vector.load %arg3[%c0_2, %c0_3] : memref<8x256xf32, #tpu.memory_space<vmem>>, vector<8x256xf32>
    %c3_i32 = arith.constant 3 : i32
    %5 = tpu.dynamic_rotate %4 by %c3_i32 dim 1 : vector<8x256xf32>, i32 -> vector<8x256xf32>
    %c2_i32 = arith.constant 2 : i32
    %6 = tpu.dynamic_rotate %4 by %c2_i32 dim 1 : vector<8x256xf32>, i32 -> vector<8x256xf32>
    %c1_i32 = arith.constant 1 : i32
    %7 = tpu.dynamic_rotate %4 by %c1_i32 dim 1 : vector<8x256xf32>, i32 -> vector<8x256xf32>
    %c255_i32 = arith.constant 255 : i32
    %8 = tpu.dynamic_rotate %4 by %c255_i32 dim 1 : vector<8x256xf32>, i32 -> vector<8x256xf32>
    %c254_i32 = arith.constant 254 : i32
    %9 = tpu.dynamic_rotate %4 by %c254_i32 dim 1 : vector<8x256xf32>, i32 -> vector<8x256xf32>
    %c253_i32 = arith.constant 253 : i32
    %10 = tpu.dynamic_rotate %4 by %c253_i32 dim 1 : vector<8x256xf32>, i32 -> vector<8x256xf32>
    %c208_i32 = arith.constant 208 : i32
    %11 = tpu.dynamic_rotate %3 by %c208_i32 dim 1 : vector<8x256xf32>, i32 -> vector<8x256xf32>
    %12 = arith.mulf %11, %5 : vector<8x256xf32>
    %cst = arith.constant dense<0.000000e+00> : vector<256xf32>
    %13 = vector.multi_reduction <add>, %12, %cst [0] : vector<8x256xf32> to vector<256xf32>
    %14 = vector.shape_cast %13 : vector<256xf32> to vector<1x256xf32>
    %15 = arith.mulf %11, %6 : vector<8x256xf32>
    %cst_4 = arith.constant dense<0.000000e+00> : vector<256xf32>
    %16 = vector.multi_reduction <add>, %15, %cst_4 [0] : vector<8x256xf32> to vector<256xf32>
    %17 = vector.shape_cast %16 : vector<256xf32> to vector<1x256xf32>
    %18 = arith.mulf %11, %7 : vector<8x256xf32>
    %cst_5 = arith.constant dense<0.000000e+00> : vector<256xf32>
    %19 = vector.multi_reduction <add>, %18, %cst_5 [0] : vector<8x256xf32> to vector<256xf32>
    %20 = vector.shape_cast %19 : vector<256xf32> to vector<1x256xf32>
    %21 = arith.mulf %11, %4 : vector<8x256xf32>
    %cst_6 = arith.constant dense<0.000000e+00> : vector<256xf32>
    %22 = vector.multi_reduction <add>, %21, %cst_6 [0] : vector<8x256xf32> to vector<256xf32>
    %23 = vector.shape_cast %22 : vector<256xf32> to vector<1x256xf32>
    %24 = arith.mulf %11, %8 : vector<8x256xf32>
    %cst_7 = arith.constant dense<0.000000e+00> : vector<256xf32>
    %25 = vector.multi_reduction <add>, %24, %cst_7 [0] : vector<8x256xf32> to vector<256xf32>
    %26 = vector.shape_cast %25 : vector<256xf32> to vector<1x256xf32>
    %27 = arith.mulf %11, %9 : vector<8x256xf32>
    %cst_8 = arith.constant dense<0.000000e+00> : vector<256xf32>
    %28 = vector.multi_reduction <add>, %27, %cst_8 [0] : vector<8x256xf32> to vector<256xf32>
    %29 = vector.shape_cast %28 : vector<256xf32> to vector<1x256xf32>
    %30 = arith.mulf %11, %10 : vector<8x256xf32>
    %cst_9 = arith.constant dense<0.000000e+00> : vector<256xf32>
    %31 = vector.multi_reduction <add>, %30, %cst_9 [0] : vector<8x256xf32> to vector<256xf32>
    %32 = vector.shape_cast %31 : vector<256xf32> to vector<1x256xf32>
    %c224_i32 = arith.constant 224 : i32
    %33 = tpu.dynamic_rotate %3 by %c224_i32 dim 1 : vector<8x256xf32>, i32 -> vector<8x256xf32>
    %34 = arith.mulf %33, %5 : vector<8x256xf32>
    %cst_10 = arith.constant dense<0.000000e+00> : vector<256xf32>
    %35 = vector.multi_reduction <add>, %34, %cst_10 [0] : vector<8x256xf32> to vector<256xf32>
    %36 = vector.shape_cast %35 : vector<256xf32> to vector<1x256xf32>
    %37 = arith.mulf %33, %6 : vector<8x256xf32>
    %cst_11 = arith.constant dense<0.000000e+00> : vector<256xf32>
    %38 = vector.multi_reduction <add>, %37, %cst_11 [0] : vector<8x256xf32> to vector<256xf32>
    %39 = vector.shape_cast %38 : vector<256xf32> to vector<1x256xf32>
    %40 = arith.mulf %33, %7 : vector<8x256xf32>
    %cst_12 = arith.constant dense<0.000000e+00> : vector<256xf32>
    %41 = vector.multi_reduction <add>, %40, %cst_12 [0] : vector<8x256xf32> to vector<256xf32>
    %42 = vector.shape_cast %41 : vector<256xf32> to vector<1x256xf32>
    %43 = arith.mulf %33, %4 : vector<8x256xf32>
    %cst_13 = arith.constant dense<0.000000e+00> : vector<256xf32>
    %44 = vector.multi_reduction <add>, %43, %cst_13 [0] : vector<8x256xf32> to vector<256xf32>
    %45 = vector.shape_cast %44 : vector<256xf32> to vector<1x256xf32>
    %46 = arith.mulf %33, %8 : vector<8x256xf32>
    %cst_14 = arith.constant dense<0.000000e+00> : vector<256xf32>
    %47 = vector.multi_reduction <add>, %46, %cst_14 [0] : vector<8x256xf32> to vector<256xf32>
    %48 = vector.shape_cast %47 : vector<256xf32> to vector<1x256xf32>
    %49 = arith.mulf %33, %9 : vector<8x256xf32>
    %cst_15 = arith.constant dense<0.000000e+00> : vector<256xf32>
    %50 = vector.multi_reduction <add>, %49, %cst_15 [0] : vector<8x256xf32> to vector<256xf32>
    %51 = vector.shape_cast %50 : vector<256xf32> to vector<1x256xf32>
    %52 = arith.mulf %33, %10 : vector<8x256xf32>
    %cst_16 = arith.constant dense<0.000000e+00> : vector<256xf32>
    %53 = vector.multi_reduction <add>, %52, %cst_16 [0] : vector<8x256xf32> to vector<256xf32>
    %54 = vector.shape_cast %53 : vector<256xf32> to vector<1x256xf32>
    %c240_i32 = arith.constant 240 : i32
    %55 = tpu.dynamic_rotate %3 by %c240_i32 dim 1 : vector<8x256xf32>, i32 -> vector<8x256xf32>
    %56 = arith.mulf %55, %5 : vector<8x256xf32>
    %cst_17 = arith.constant dense<0.000000e+00> : vector<256xf32>
    %57 = vector.multi_reduction <add>, %56, %cst_17 [0] : vector<8x256xf32> to vector<256xf32>
    %58 = vector.shape_cast %57 : vector<256xf32> to vector<1x256xf32>
    %59 = arith.mulf %55, %6 : vector<8x256xf32>
    %cst_18 = arith.constant dense<0.000000e+00> : vector<256xf32>
    %60 = vector.multi_reduction <add>, %59, %cst_18 [0] : vector<8x256xf32> to vector<256xf32>
    %61 = vector.shape_cast %60 : vector<256xf32> to vector<1x256xf32>
    %62 = arith.mulf %55, %7 : vector<8x256xf32>
    %cst_19 = arith.constant dense<0.000000e+00> : vector<256xf32>
    %63 = vector.multi_reduction <add>, %62, %cst_19 [0] : vector<8x256xf32> to vector<256xf32>
    %64 = vector.shape_cast %63 : vector<256xf32> to vector<1x256xf32>
    %65 = arith.mulf %55, %4 : vector<8x256xf32>
    %cst_20 = arith.constant dense<0.000000e+00> : vector<256xf32>
    %66 = vector.multi_reduction <add>, %65, %cst_20 [0] : vector<8x256xf32> to vector<256xf32>
    %67 = vector.shape_cast %66 : vector<256xf32> to vector<1x256xf32>
    %68 = arith.mulf %55, %8 : vector<8x256xf32>
    %cst_21 = arith.constant dense<0.000000e+00> : vector<256xf32>
    %69 = vector.multi_reduction <add>, %68, %cst_21 [0] : vector<8x256xf32> to vector<256xf32>
    %70 = vector.shape_cast %69 : vector<256xf32> to vector<1x256xf32>
    %71 = arith.mulf %55, %9 : vector<8x256xf32>
    %cst_22 = arith.constant dense<0.000000e+00> : vector<256xf32>
    %72 = vector.multi_reduction <add>, %71, %cst_22 [0] : vector<8x256xf32> to vector<256xf32>
    %73 = vector.shape_cast %72 : vector<256xf32> to vector<1x256xf32>
    %74 = arith.mulf %55, %10 : vector<8x256xf32>
    %cst_23 = arith.constant dense<0.000000e+00> : vector<256xf32>
    %75 = vector.multi_reduction <add>, %74, %cst_23 [0] : vector<8x256xf32> to vector<256xf32>
    %76 = vector.shape_cast %75 : vector<256xf32> to vector<1x256xf32>
    %77 = arith.mulf %3, %5 : vector<8x256xf32>
    %cst_24 = arith.constant dense<0.000000e+00> : vector<256xf32>
    %78 = vector.multi_reduction <add>, %77, %cst_24 [0] : vector<8x256xf32> to vector<256xf32>
    %79 = vector.shape_cast %78 : vector<256xf32> to vector<1x256xf32>
    %80 = arith.mulf %3, %6 : vector<8x256xf32>
    %cst_25 = arith.constant dense<0.000000e+00> : vector<256xf32>
    %81 = vector.multi_reduction <add>, %80, %cst_25 [0] : vector<8x256xf32> to vector<256xf32>
    %82 = vector.shape_cast %81 : vector<256xf32> to vector<1x256xf32>
    %83 = arith.mulf %3, %7 : vector<8x256xf32>
    %cst_26 = arith.constant dense<0.000000e+00> : vector<256xf32>
    %84 = vector.multi_reduction <add>, %83, %cst_26 [0] : vector<8x256xf32> to vector<256xf32>
    %85 = vector.shape_cast %84 : vector<256xf32> to vector<1x256xf32>
    %86 = arith.mulf %3, %4 : vector<8x256xf32>
    %cst_27 = arith.constant dense<0.000000e+00> : vector<256xf32>
    %87 = vector.multi_reduction <add>, %86, %cst_27 [0] : vector<8x256xf32> to vector<256xf32>
    %88 = vector.shape_cast %87 : vector<256xf32> to vector<1x256xf32>
    %89 = arith.mulf %3, %8 : vector<8x256xf32>
    %cst_28 = arith.constant dense<0.000000e+00> : vector<256xf32>
    %90 = vector.multi_reduction <add>, %89, %cst_28 [0] : vector<8x256xf32> to vector<256xf32>
    %91 = vector.shape_cast %90 : vector<256xf32> to vector<1x256xf32>
    %92 = arith.mulf %3, %9 : vector<8x256xf32>
    %cst_29 = arith.constant dense<0.000000e+00> : vector<256xf32>
    %93 = vector.multi_reduction <add>, %92, %cst_29 [0] : vector<8x256xf32> to vector<256xf32>
    %94 = vector.shape_cast %93 : vector<256xf32> to vector<1x256xf32>
    %95 = arith.mulf %3, %10 : vector<8x256xf32>
    %cst_30 = arith.constant dense<0.000000e+00> : vector<256xf32>
    %96 = vector.multi_reduction <add>, %95, %cst_30 [0] : vector<8x256xf32> to vector<256xf32>
    %97 = vector.shape_cast %96 : vector<256xf32> to vector<1x256xf32>
    %c16_i32 = arith.constant 16 : i32
    %98 = tpu.dynamic_rotate %3 by %c16_i32 dim 1 : vector<8x256xf32>, i32 -> vector<8x256xf32>
    %99 = arith.mulf %98, %5 : vector<8x256xf32>
    %cst_31 = arith.constant dense<0.000000e+00> : vector<256xf32>
    %100 = vector.multi_reduction <add>, %99, %cst_31 [0] : vector<8x256xf32> to vector<256xf32>
    %101 = vector.shape_cast %100 : vector<256xf32> to vector<1x256xf32>
    %102 = arith.mulf %98, %6 : vector<8x256xf32>
    %cst_32 = arith.constant dense<0.000000e+00> : vector<256xf32>
    %103 = vector.multi_reduction <add>, %102, %cst_32 [0] : vector<8x256xf32> to vector<256xf32>
    %104 = vector.shape_cast %103 : vector<256xf32> to vector<1x256xf32>
    %105 = arith.mulf %98, %7 : vector<8x256xf32>
    %cst_33 = arith.constant dense<0.000000e+00> : vector<256xf32>
    %106 = vector.multi_reduction <add>, %105, %cst_33 [0] : vector<8x256xf32> to vector<256xf32>
    %107 = vector.shape_cast %106 : vector<256xf32> to vector<1x256xf32>
    %108 = arith.mulf %98, %4 : vector<8x256xf32>
    %cst_34 = arith.constant dense<0.000000e+00> : vector<256xf32>
    %109 = vector.multi_reduction <add>, %108, %cst_34 [0] : vector<8x256xf32> to vector<256xf32>
    %110 = vector.shape_cast %109 : vector<256xf32> to vector<1x256xf32>
    %111 = arith.mulf %98, %8 : vector<8x256xf32>
    %cst_35 = arith.constant dense<0.000000e+00> : vector<256xf32>
    %112 = vector.multi_reduction <add>, %111, %cst_35 [0] : vector<8x256xf32> to vector<256xf32>
    %113 = vector.shape_cast %112 : vector<256xf32> to vector<1x256xf32>
    %114 = arith.mulf %98, %9 : vector<8x256xf32>
    %cst_36 = arith.constant dense<0.000000e+00> : vector<256xf32>
    %115 = vector.multi_reduction <add>, %114, %cst_36 [0] : vector<8x256xf32> to vector<256xf32>
    %116 = vector.shape_cast %115 : vector<256xf32> to vector<1x256xf32>
    %117 = arith.mulf %98, %10 : vector<8x256xf32>
    %cst_37 = arith.constant dense<0.000000e+00> : vector<256xf32>
    %118 = vector.multi_reduction <add>, %117, %cst_37 [0] : vector<8x256xf32> to vector<256xf32>
    %119 = vector.shape_cast %118 : vector<256xf32> to vector<1x256xf32>
    %c32_i32 = arith.constant 32 : i32
    %120 = tpu.dynamic_rotate %3 by %c32_i32 dim 1 : vector<8x256xf32>, i32 -> vector<8x256xf32>
    %121 = arith.mulf %120, %5 : vector<8x256xf32>
    %cst_38 = arith.constant dense<0.000000e+00> : vector<256xf32>
    %122 = vector.multi_reduction <add>, %121, %cst_38 [0] : vector<8x256xf32> to vector<256xf32>
    %123 = vector.shape_cast %122 : vector<256xf32> to vector<1x256xf32>
    %124 = arith.mulf %120, %6 : vector<8x256xf32>
    %cst_39 = arith.constant dense<0.000000e+00> : vector<256xf32>
    %125 = vector.multi_reduction <add>, %124, %cst_39 [0] : vector<8x256xf32> to vector<256xf32>
    %126 = vector.shape_cast %125 : vector<256xf32> to vector<1x256xf32>
    %127 = arith.mulf %120, %7 : vector<8x256xf32>
    %cst_40 = arith.constant dense<0.000000e+00> : vector<256xf32>
    %128 = vector.multi_reduction <add>, %127, %cst_40 [0] : vector<8x256xf32> to vector<256xf32>
    %129 = vector.shape_cast %128 : vector<256xf32> to vector<1x256xf32>
    %130 = arith.mulf %120, %4 : vector<8x256xf32>
    %cst_41 = arith.constant dense<0.000000e+00> : vector<256xf32>
    %131 = vector.multi_reduction <add>, %130, %cst_41 [0] : vector<8x256xf32> to vector<256xf32>
    %132 = vector.shape_cast %131 : vector<256xf32> to vector<1x256xf32>
    %133 = arith.mulf %120, %8 : vector<8x256xf32>
    %cst_42 = arith.constant dense<0.000000e+00> : vector<256xf32>
    %134 = vector.multi_reduction <add>, %133, %cst_42 [0] : vector<8x256xf32> to vector<256xf32>
    %135 = vector.shape_cast %134 : vector<256xf32> to vector<1x256xf32>
    %136 = arith.mulf %120, %9 : vector<8x256xf32>
    %cst_43 = arith.constant dense<0.000000e+00> : vector<256xf32>
    %137 = vector.multi_reduction <add>, %136, %cst_43 [0] : vector<8x256xf32> to vector<256xf32>
    %138 = vector.shape_cast %137 : vector<256xf32> to vector<1x256xf32>
    %139 = arith.mulf %120, %10 : vector<8x256xf32>
    %cst_44 = arith.constant dense<0.000000e+00> : vector<256xf32>
    %140 = vector.multi_reduction <add>, %139, %cst_44 [0] : vector<8x256xf32> to vector<256xf32>
    %141 = vector.shape_cast %140 : vector<256xf32> to vector<1x256xf32>
    %c48_i32 = arith.constant 48 : i32
    %142 = tpu.dynamic_rotate %3 by %c48_i32 dim 1 : vector<8x256xf32>, i32 -> vector<8x256xf32>
    %143 = arith.mulf %142, %5 : vector<8x256xf32>
    %cst_45 = arith.constant dense<0.000000e+00> : vector<256xf32>
    %144 = vector.multi_reduction <add>, %143, %cst_45 [0] : vector<8x256xf32> to vector<256xf32>
    %145 = vector.shape_cast %144 : vector<256xf32> to vector<1x256xf32>
    %146 = arith.mulf %142, %6 : vector<8x256xf32>
    %cst_46 = arith.constant dense<0.000000e+00> : vector<256xf32>
    %147 = vector.multi_reduction <add>, %146, %cst_46 [0] : vector<8x256xf32> to vector<256xf32>
    %148 = vector.shape_cast %147 : vector<256xf32> to vector<1x256xf32>
    %149 = arith.mulf %142, %7 : vector<8x256xf32>
    %cst_47 = arith.constant dense<0.000000e+00> : vector<256xf32>
    %150 = vector.multi_reduction <add>, %149, %cst_47 [0] : vector<8x256xf32> to vector<256xf32>
    %151 = vector.shape_cast %150 : vector<256xf32> to vector<1x256xf32>
    %152 = arith.mulf %142, %4 : vector<8x256xf32>
    %cst_48 = arith.constant dense<0.000000e+00> : vector<256xf32>
    %153 = vector.multi_reduction <add>, %152, %cst_48 [0] : vector<8x256xf32> to vector<256xf32>
    %154 = vector.shape_cast %153 : vector<256xf32> to vector<1x256xf32>
    %155 = arith.mulf %142, %8 : vector<8x256xf32>
    %cst_49 = arith.constant dense<0.000000e+00> : vector<256xf32>
    %156 = vector.multi_reduction <add>, %155, %cst_49 [0] : vector<8x256xf32> to vector<256xf32>
    %157 = vector.shape_cast %156 : vector<256xf32> to vector<1x256xf32>
    %158 = arith.mulf %142, %9 : vector<8x256xf32>
    %cst_50 = arith.constant dense<0.000000e+00> : vector<256xf32>
    %159 = vector.multi_reduction <add>, %158, %cst_50 [0] : vector<8x256xf32> to vector<256xf32>
    %160 = vector.shape_cast %159 : vector<256xf32> to vector<1x256xf32>
    %161 = arith.mulf %142, %10 : vector<8x256xf32>
    %cst_51 = arith.constant dense<0.000000e+00> : vector<256xf32>
    %162 = vector.multi_reduction <add>, %161, %cst_51 [0] : vector<8x256xf32> to vector<256xf32>
    %163 = vector.shape_cast %162 : vector<256xf32> to vector<1x256xf32>
    %c0_52 = arith.constant 0 : index
    %c0_53 = arith.constant 0 : index
    %c0_54 = arith.constant 0 : index
    %164 = vector.load %arg4[%c0_52, %c0_53, %c0_54] : memref<1x49x256xf32, #tpu.memory_space<vmem>>, vector<1x49x256xf32>
    %165 = vector.shape_cast %164 : vector<1x49x256xf32> to vector<49x256xf32>
    %166 = tpu.concatenate %14, %17, %20, %23, %26, %29, %32, %36, %39, %42, %45, %48, %51, %54, %58, %61 in 0 : vector<1x256xf32>, vector<1x256xf32>, vector<1x256xf32>, vector<1x256xf32>, vector<1x256xf32>, vector<1x256xf32>, vector<1x256xf32>, vector<1x256xf32>, vector<1x256xf32>, vector<1x256xf32>, vector<1x256xf32>, vector<1x256xf32>, vector<1x256xf32>, vector<1x256xf32>, vector<1x256xf32>, vector<1x256xf32> -> vector<16x256xf32>
    %167 = tpu.concatenate %64, %67, %70, %73, %76, %79, %82, %85, %88, %91, %94, %97, %101, %104, %107, %110 in 0 : vector<1x256xf32>, vector<1x256xf32>, vector<1x256xf32>, vector<1x256xf32>, vector<1x256xf32>, vector<1x256xf32>, vector<1x256xf32>, vector<1x256xf32>, vector<1x256xf32>, vector<1x256xf32>, vector<1x256xf32>, vector<1x256xf32>, vector<1x256xf32>, vector<1x256xf32>, vector<1x256xf32>, vector<1x256xf32> -> vector<16x256xf32>
    %168 = tpu.concatenate %113, %116, %119, %123, %126, %129, %132, %135, %138, %141, %145, %148, %151, %154, %157, %160 in 0 : vector<1x256xf32>, vector<1x256xf32>, vector<1x256xf32>, vector<1x256xf32>, vector<1x256xf32>, vector<1x256xf32>, vector<1x256xf32>, vector<1x256xf32>, vector<1x256xf32>, vector<1x256xf32>, vector<1x256xf32>, vector<1x256xf32>, vector<1x256xf32>, vector<1x256xf32>, vector<1x256xf32>, vector<1x256xf32> -> vector<16x256xf32>
    %169 = tpu.concatenate %166, %167, %168, %163 in 0 : vector<16x256xf32>, vector<16x256xf32>, vector<16x256xf32>, vector<1x256xf32> -> vector<49x256xf32>
    %170 = arith.addf %165, %169 : vector<49x256xf32>
    %c0_55 = arith.constant 0 : index
    %c0_56 = arith.constant 0 : index
    %c0_57 = arith.constant 0 : index
    %171 = vector.load %arg4[%c0_55, %c0_56, %c0_57] : memref<1x49x256xf32, #tpu.memory_space<vmem>>, vector<1x49x256xf32>
    %172 = vector.shape_cast %171 : vector<1x49x256xf32> to vector<49x256xf32>
    %173 = vector.shape_cast %170 : vector<49x256xf32> to vector<1x49x256xf32>
    tpu.vector_store %arg4[%c0_55, %c0_56, %c0_57], %173 {strides = array<i32>} : memref<1x49x256xf32, #tpu.memory_space<vmem>>, vector<1x49x256xf32>,
    return
  }
  func.func @transform_0(%arg0: i32, %arg1: i32) -> (i32, i32) {
    %c1_i32 = arith.constant 1 : i32
    %0 = arith.muli %arg0, %c1_i32 : i32
    %1 = arith.addi %0, %arg1 : i32
    %c0_i32 = arith.constant 0 : i32
    %c0_i32_0 = arith.constant 0 : i32
    return %1, %c0_i32 : i32, i32
  }
  func.func @transform_1(%arg0: i32, %arg1: i32) -> (i32, i32) {
    %c1_i32 = arith.constant 1 : i32
    %0 = arith.muli %arg0, %c1_i32 : i32
    %1 = arith.addi %0, %arg1 : i32
    %c0_i32 = arith.constant 0 : i32
    %c0_i32_0 = arith.constant 0 : i32
    return %1, %c0_i32 : i32, i32
  }
  func.func @transform_2(%arg0: i32, %arg1: i32) -> (i32, i32, i32) {
    %c0_i32 = arith.constant 0 : i32
    %c0_i32_0 = arith.constant 0 : i32
    %c0_i32_1 = arith.constant 0 : i32
    return %arg0, %c0_i32, %c0_i32_0 : i32, i32, i32
  }
}

</mosaic_0001>

<bundles_post_ra>
// kernel: tpu_custom_call.1
= control target key start
LH: loop header
LB: loop body
LE: loop exit
PB: predicated region body
PF: predicated region fallthrough
CT: control target
= control target key end

     0   :  { %7 = vsyncpa [#allocation3], 0  ;;  %s2146_s0 = inlined_call_operand.hbm [shape: f32[16,256], index: 0, kind: input, shape index: {}]   ;;  %s2147_s1 = inlined_call_operand.hbm [shape: f32[16,256], index: 1, kind: input, shape index: {}]   ;;  %s2148_s2 = inlined_call_operand.vmem [shape: f32[2,49,256], index: 2, kind: output, shape index: {}]  }
   0x1   :  { %9 = vsyncpa [#allocation3 + $0x1], 0 }
   0x2   :  { %10 = vsyncpa [#allocation5], 0 }
   0x3   :  { %12 = vsyncpa [#allocation5 + $0x1], 0  ;;  %s1487_s9 = smov 0   ;;  %s1489_s10 = smov 0  }
   0x4   :  { %s1491_s11 = smov 0   ;;  %s1493_s12 = smov 0  }
   0x5   :  { %s1495_s13 = smov 0   ;;  %s1497_s14 = smov 0  }
   0x6 LB: > { %s1247_s15 = sadd.s32 4294967295, %s1455_s14   ;;  %s30_s16 = sadd.s32 1, %s1451_s13  ;;  %s1455_s14 = sphi %s1497_s14, %s18_s14   ;;  %s1451_s13 = sphi %s1495_s13, %s2162_s13   ;;  %s1447_s12 = sphi %s1493_s12, %s2161_s12   ;;  %s1443_s11 = sphi %s1491_s11, %s2160_s11   ;;  %s1439_s10 = sphi %s1489_s10, %s2159_s10   ;;  %s1435_s9 = sphi %s1487_s9, %s2158_s9  }
   0x7   : > { %p32_p0 = scmp.ge.s32.totalorder %s30_s16, 2  ;;  %s39_s17 = sadd.s32 1, %s1443_s11 }
   0x8   : > { %p46_p1 = scmp.ne.s32.totalorder %s1443_s11, %s1439_s10  ;;  %p47_p2 = scmp.eq.s32.totalorder %s1455_s14, 0 }
   0x9   : > { %s2164_s16 = smov (%p32_p0, %s30_s16), 0  ;;  %p52_p4 = scmp.ne.s32.totalorder %s1439_s10, %s1435_s9 }
   0xa   : > { %p1523_p3 = por %p47_p2, %p46_p1  ;;  %s36_s19 = ssub.s32 %s1451_s13, %s2164_s16 }
   0xb   : > { %p53_p5 = scmp.eq.s32.totalorder %s1247_s15, 0  ;;  %p37_p6 = scmp.eq.s32.totalorder %s36_s19, 0 }
   0xc   : > { %p1277_p8 = scmp.lt.s32.totalorder %s1455_s14, 2  ;;  %s1539_s22 = sand.u32 1, %s1443_s11  }
   0xd   : > { %p1530_p7 = por %p53_p5, %p52_p4  ;;  %s1263_s23 = sshll.u32 %s1451_s13, 8 }
   0xe   : > { %s1536_s21 = scalar_select %p37_p6, %s1443_s11, %s39_s17  }
   0xf   : > { %s2151_s20 = scalar_select %p1530_p7, 1, 0 }
  0x10   : > { %s1251_s24 = sshll.u32 %s1539_s22, 4  ;;  %s1548_s27 = scalar_lea.hbm %s2146_s0, %s1263_s23 }
  0x11   : > { %s134_s28 = scalar_lea.vmem [#allocation2], %s1251_s24  ;;  %p1554_p9 = pnand %p1277_p8, %p1523_p3 }
  0x12   : > { %s143_s29 = sshll.u32 %s134_s28, 4  ;;  %s131_s3 = scalar_lea.sflag [#allocation3], %s1539_s22  ;;  %s1558_s29 = int_to_ptr.vmem [resolvable:$true] %s143_s29 }
  0x13   : > { %s1341_s4 = scalar_lea.hbm %s1548_s27, 256  ;;  %p1343_p13 = pneg %p1554_p9 }
  0x14   : > { %p1342_p12 = scmp.ne.s32.totalorder %s1548_s27, %s1341_s4  ;;  %s1346_s7 = scalar_lea.hbm %s2146_s0, 512 }
  0x15   : > { %p1347_p2 = scmp.lt.u32.totalorder %s1548_s27, %s2146_s0  ;;  %p1348_p3 = scmp.lt.u32.totalorder %s1346_s7, %s1341_s4 }
  0x16   : > { %p1344_p0 = pnand %p1343_p13, %p1342_p12  ;;  %p1350_p5 = scmp.lt.u32.totalorder %s1341_s4, %s1548_s27 }
  0x17   : > { %p1349_p4 = por %p1348_p3, %p1347_p2 }
  0x18   : > { %p1345_p1 = pneg %p1344_p0 }
  0x19   : > { %p1351_p6 = por %p1350_p5, %p1349_p4 }
  0x1b   : > { %p1352_p8 = pnand %p1351_p6, %p1345_p1 }
  0x1d   : > { %1355 = shalt.err (!%p1352_p8)
}
  0x1e   : > { %s1356_s15 = scalar_lea.vmem %s1558_s29, 256  ;;  %s1457_s17 = smov [#allocation2]  }
  0x1f   : > { %p1357_p12 = scmp.ne.s32.totalorder %s1558_s29, %s1356_s15  ;;  %s1361_s18 = sshll.u32 %s1457_s17, 4  ;;  %s1362_s18 = int_to_ptr.vmem [resolvable:$false] %s1361_s18 }
  0x20   : > { %s1363_s19 = scalar_lea.vmem %s1362_s18, 512  ;;  %p1364_p11 = scmp.lt.s32.totalorder %s1558_s29, %s1362_s18 }
  0x21   : > { %p1359_p0 = pnand %p1357_p12, %p1343_p13  ;;  %p1365_p2 = scmp.lt.s32.totalorder %s1363_s19, %s1356_s15 }
  0x23   : > { %p1360_p10 = pneg %p1359_p0  ;;  %p1366_p3 = por %p1365_p2, %p1364_p11 }
  0x25   : > { %p1367_p4 = pnand %p1366_p3, %p1360_p10 }
  0x27   : > { %1370 = shalt.err (!%p1367_p4)
}
  0x28   : > { %1273 = dma.hbm_to_vmem [thread:$0]  (!%p1554_p9), %s1548_s27, 256, %s1558_s29, %s131_s3  }
  0x29   : > { %p2153_p1 = scmp.lt.s32.totalorder %s1455_s14, 3  ;;  %p2154_p5 = scmp.ge.s32.totalorder %s1455_s14, 1 }
  0x2a   : > { %s1601_s4 = scalar_lea.hbm %s2147_s1, %s1263_s23  ;;  %s154_s5 = scalar_lea.vmem [#allocation4], %s1251_s24 }
  0x2b   : > { %p1592_p6 = pnand %p2154_p5, %p2153_p1  ;;  %s163_s6 = sshll.u32 %s154_s5, 4  ;;  %s164_s6 = int_to_ptr.vmem [resolvable:$true] %s163_s6 }
  0x2c   : > { %s151_s27 = scalar_lea.sflag [#allocation5], %s1539_s22  ;;  %s1371_s29 = scalar_lea.hbm %s1601_s4, 256 }
  0x2d   : > { %s2155_s25 = scalar_select %p1592_p6, 1, 0 }
  0x2e   : > { %p1372_p10 = scmp.ne.s32.totalorder %s1601_s4, %s1371_s29  ;;  %s1376_s23 = scalar_lea.hbm %s2147_s1, 512 }
  0x2f   : > { %p1377_p12 = scmp.lt.u32.totalorder %s1601_s4, %s2147_s1  ;;  %p1378_p0 = scmp.lt.u32.totalorder %s1376_s23, %s1371_s29 }
  0x30   : > { %p1374_p11 = pnand %p1372_p10, %p1343_p13  ;;  %p1380_p3 = scmp.lt.u32.totalorder %s1371_s29, %s1601_s4 }
  0x31   : > { %p1379_p2 = por %p1378_p0, %p1377_p12 }
  0x32   : > { %p1375_p8 = pneg %p1374_p11 }
  0x33   : > { %p1381_p4 = por %p1380_p3, %p1379_p2 }
  0x35   : > { %p1382_p1 = pnand %p1381_p4, %p1375_p8 }
  0x37   : > { %1385 = shalt.err (!%p1382_p1)
}
  0x38   : > { %s1386_s22 = scalar_lea.vmem %s164_s6, 256  ;;  %s1458_s24 = smov [#allocation4]  }
  0x39   : > { %p1387_p5 = scmp.ne.s32.totalorder %s164_s6, %s1386_s22  ;;  %s1391_s15 = sshll.u32 %s1458_s24, 4  ;;  %s1392_s15 = int_to_ptr.vmem [resolvable:$false] %s1391_s15 }
  0x3a   : > { %s1393_s17 = scalar_lea.vmem %s1392_s15, 512  ;;  %p1394_p7 = scmp.lt.s32.totalorder %s164_s6, %s1392_s15 }
  0x3b   : > { %p1389_p10 = pnand %p1387_p5, %p1343_p13  ;;  %p1395_p6 = scmp.lt.s32.totalorder %s1393_s17, %s1386_s22 }
  0x3d   : > { %p1390_p11 = pneg %p1389_p10  ;;  %p1396_p0 = por %p1395_p6, %p1394_p7 }
  0x3f   : > { %p1397_p12 = pnand %p1396_p0, %p1390_p11 }
  0x41   : > { %1400 = shalt.err (!%p1397_p12)
}
  0x42   : > { %1276 = dma.hbm_to_vmem [thread:$0]  (!%p1554_p9), %s1601_s4, 256, %s164_s6, %s151_s27  }
  0x43   : > { %p2156_p8 = scmp.ne.s32.totalorder %s2155_s25, 0 }
  0x44   : > { %s174_s18 = sand.u32 (!%p2156_p8), 1, %s1439_s10   ;;  %p2157_p13 = scmp.ne.s32.totalorder (!%p2156_p8), %s2151_s20, 0 }
  0x45   : > { %172 = sbr.rel (%p2156_p8) target bundleno = 401 (0x191), region = 28  ;;  %s1258_s19 = sshll.u32 (!%p2156_p8), %s174_s18, 4 }
  0x46   : > { %s175_s26 = scalar_lea.sflag (!%p2156_p8), [#allocation3], %s174_s18  ;;  %s178_s28 = scalar_lea.vmem (!%p2156_p8), [#allocation2], %s1258_s19 }
  0x4c   : > { %1426 = dma.done.wait (%p2157_p13), %s175_s26, 256  }
  0x4d   : > { %1428 = vsyncadd (%p2157_p13), %s175_s26, 4294967040  ;;  %s184_s5 = scalar_lea.sflag [#allocation5], %s174_s18  ;;  %s1632_s29 = scalar_lea.vmem [#allocation4], %s1258_s19 }
  0x4e   : > { %1430 = dma.done.wait (%p2157_p13), %s184_s5, 256  }
  0x4f   : > { %1432 = vsyncadd (%p2157_p13), %s184_s5, 4294967040  ;;  %v1639_v0 = vld [vmem:[%s1632_s29] sm:$0xff]  ;;  %s1459_s30 = smov 2   ;;  %s1460_s25 = smov 3   ;;  %v1644_v1 = vld [vmem:[%s1632_s29 + $0x8] sm:$0xff]  ;;  %v1471_v4 = vmov 0.0   ;;  %v246_v7 = vlaneseq }
  0x50   : > { %251 = vrot.lane.b32.xlu1 %v1639_v0, %s1459_s30  ;;  %242 = vrot.lane.b32.xlu0 %v1639_v0, %s1460_s25  ;;  %s1461_s4 = smov 1   ;;  %s1462_s20 = smov 127   ;;  %v1656_v2 = vld [vmem:[%s178_s28 + $0x8] sm:$0xff]  ;;  %v1658_v3 = vld [vmem:[%s178_s28] sm:$0xff]  ;;  %vm1028_vm5 = vcmask 1040384   ;;  %vm1031_vm8 = vcmask 1041408  }
  0x51   : > { %s1463_s6 = smov 126   ;;  %s1464_s27 = smov 125   ;;  %v643_v5 = vmul.f32 %v1639_v0, %v1658_v3  ;;  %v644_v6 = vmul.f32 %v1644_v1, %v1656_v2  ;;  %v1685_v10 = vand.u32 127, %v246_v7  ;;  %vm1037_vm9 = vcmask 1043456  }
  0x52   : > { %s1465_s3 = smov 80   ;;  %s1466_s7 = smov 96   ;;  %vm1034_vm10 = vcmask 1042432   ;;  %vm1040_vm12 = vcmask 1044480   ;;  %vm1043_vm13 = vcmask 1045504   ;;  %vm1046_vm14 = vcmask 1046528  }
  0x53   : > { %s1467_s23 = smov 112   ;;  %s1468_s8 = smov 16   ;;  %v645_v8 = vrot.slane %v643_v5, 4  ;;  %v651_v9 = vrot.slane %v644_v6, 4  ;;  %vm255_vm0 = vcmp.lt.s32.totalorder %v1685_v10, 2  ;;  %vm248_vm1 = vcmp.lt.s32.totalorder %v1685_v10, 3 }
  0x54   : > { %253 = vrot.lane.b32.xlu1 %v1644_v1, %s1459_s30  ;;  %244 = vrot.lane.b32.xlu0 %v1644_v1, %s1460_s25  ;;  %s1469_s9 = smov 32   ;;  %s1470_s22 = smov 48   ;;  %vm262_vm2 = vcmp.lt.s32.totalorder %v1685_v10, 1  ;;  %vm269_vm3 = vcmp.lt.s32.totalorder %v1685_v10, 127  ;;  %vm276_vm4 = vcmp.lt.s32.totalorder %v1685_v10, 126  ;;  %vm283_vm6 = vcmp.lt.s32.totalorder %v1685_v10, 125 }
  0x55   : > { %p215_p7 = scmp.lt.s32.totalorder %s1447_s12, 1  ;;  %v646_v11 = vadd.f32 %v645_v8, %v643_v5  ;;  %v652_v12 = vadd.f32 %v651_v9, %v644_v6  ;;  %vm290_vm7 = vcmp.lt.s32.totalorder %v1685_v10, 80  ;;  %vm395_vm11 = vcmp.lt.s32.totalorder %v1685_v10, 96 }
  0x56   : > { %vm500_vm15 = vcmp.lt.s32.totalorder %v1685_v10, 112 }
  0x57   : > { %s2166_s12 = smov (!%p215_p7, %s1447_s12), 1  ;;  %v647_v15 = vrot.slane %v646_v11, 2  ;;  %v653_v16 = vrot.slane %v652_v12, 2 }
  0x58   : > { %260 = vrot.lane.b32.xlu1 %v1644_v1, %s1461_s4  ;;  %258 = vrot.lane.b32.xlu0 %v1639_v0, %s1461_s4  ;;  %s1265_s24 = smul.u32 112, %s2166_s12 }
  0x59   : > { %v648_v27 = vadd.f32 %v647_v15, %v646_v11  ;;  %v654_v28 = vadd.f32 %v653_v16, %v652_v12 }
  0x5a   : > { %s1677_s18 = scalar_lea.vmem %s2148_s2, %s1265_s24 }
  0x5b   : > { %236 = vst [vmem:[%s1677_s18 + $0x60] sm:$0x1] %v1471_v4  ;;  %237 = vst [vmem:[%s1677_s18 + $0x68] sm:$0x1] %v1471_v4  ;;  %v649_v43 = vrot.slane %v648_v27, 1  ;;  %v655_v44 = vrot.slane %v654_v28, 1 }
  0x5c   : > { %267 = vrot.lane.b32.xlu1 %v1644_v1, %s1462_s20  ;;  %265 = vrot.lane.b32.xlu0 %v1639_v0, %s1462_s20 }
  0x5d   : > { %v656_v15 = vadd.f32 %v655_v44, %v654_v28 }
  0x60   : > { %274 = vrot.lane.b32.xlu1 %v1644_v1, %s1463_s6  ;;  %272 = vrot.lane.b32.xlu0 %v1639_v0, %s1463_s6 }
  0x64   : > { %281 = vrot.lane.b32.xlu1 %v1644_v1, %s1464_s27  ;;  %279 = vrot.lane.b32.xlu0 %v1639_v0, %s1464_s27 }
  0x68   : > { %288 = vrot.lane.b32.xlu1 %v1656_v2, %s1465_s3  ;;  %286 = vrot.lane.b32.xlu0 %v1658_v3, %s1465_s3 }
  0x6c   : > { %393 = vrot.lane.b32.xlu1 %v1656_v2, %s1466_s7  ;;  %391 = vrot.lane.b32.xlu0 %v1658_v3, %s1466_s7 }
  0x70   : > { %498 = vrot.lane.b32.xlu1 %v1656_v2, %s1467_s23  ;;  %496 = vrot.lane.b32.xlu0 %v1658_v3, %s1467_s23 }
  0x74   : > { %701 = vrot.lane.b32.xlu1 %v1656_v2, %s1468_s8  ;;  %699 = vrot.lane.b32.xlu0 %v1658_v3, %s1468_s8 }
  0x78   : > { %806 = vrot.lane.b32.xlu1 %v1656_v2, %s1469_s9  ;;  %804 = vrot.lane.b32.xlu0 %v1658_v3, %s1469_s9 }
  0x7c   : > { %911 = vrot.lane.b32.xlu1 %v1656_v2, %s1470_s22  ;;  %909 = vrot.lane.b32.xlu0 %v1658_v3, %s1470_s22 }
  0xc2   : > { %v252_v13 = vpop.permute.xlu1 %251  ;;  %v243_v14 = vpop.permute.xlu0 %242 }
  0xc6   : > { %v254_v17 = vpop.permute.xlu1 %253  ;;  %v245_v18 = vpop.permute.xlu0 %244 }
  0xc7   : > { %v1690_v19 = vsel %vm255_vm0, %v252_v13, %v254_v17  ;;  %v1692_v20 = vsel %vm255_vm0, %v254_v17, %v252_v13  ;;  %v1694_v21 = vsel %vm248_vm1, %v243_v14, %v245_v18  ;;  %v1696_v22 = vsel %vm248_vm1, %v245_v18, %v243_v14 }
  0xc8   : > { %v615_v23 = vmul.f32 %v1692_v20, %v1658_v3  ;;  %v616_v24 = vmul.f32 %v1690_v19, %v1656_v2  ;;  %v601_v25 = vmul.f32 %v1696_v22, %v1658_v3  ;;  %v602_v26 = vmul.f32 %v1694_v21, %v1656_v2 }
  0xc9   : > { %v650_v14 = vadd.f32 %v649_v43, %v648_v27  ;;  %vm703_vm0 = vcmp.lt.s32.totalorder %v1685_v10, 16  ;;  %vm808_vm1 = vcmp.lt.s32.totalorder %v1685_v10, 32 }
  0xca   : > { %v617_v29 = vrot.slane %v615_v23, 4  ;;  %v623_v30 = vrot.slane %v616_v24, 4  ;;  %v603_v31 = vrot.slane %v601_v25, 4  ;;  %v609_v32 = vrot.slane %v602_v26, 4  ;;  %v261_v33 = vpop.permute.xlu1 %260  ;;  %v259_v34 = vpop.permute.xlu0 %258 }
  0xcb   : > { %v1708_v35 = vsel %vm262_vm2, %v259_v34, %v261_v33  ;;  %v1712_v36 = vsel %vm262_vm2, %v261_v33, %v259_v34  ;;  %vm913_vm2 = vcmp.lt.s32.totalorder %v1685_v10, 48 }
  0xcc   : > { %v618_v37 = vadd.f32 %v617_v29, %v615_v23  ;;  %v624_v38 = vadd.f32 %v623_v30, %v616_v24  ;;  %v604_v39 = vadd.f32 %v603_v31, %v601_v25  ;;  %v610_v40 = vadd.f32 %v609_v32, %v602_v26 }
  0xcd   : > { %v629_v41 = vmul.f32 %v1712_v36, %v1658_v3  ;;  %v630_v42 = vmul.f32 %v1708_v35, %v1656_v2 }
  0xce   : > { %v619_v45 = vrot.slane %v618_v37, 2  ;;  %v625_v46 = vrot.slane %v624_v38, 2  ;;  %v605_v47 = vrot.slane %v604_v39, 2  ;;  %v611_v48 = vrot.slane %v610_v40, 2  ;;  %v268_v49 = vpop.permute.xlu1 %267  ;;  %v266_v50 = vpop.permute.xlu0 %265 }
  0xcf   : > { %v631_v51 = vrot.slane %v629_v41, 4  ;;  %v637_v52 = vrot.slane %v630_v42, 4  ;;  %v1722_v53 = vsel %vm269_vm3, %v266_v50, %v268_v49  ;;  %v1726_v54 = vsel %vm269_vm3, %v268_v49, %v266_v50 }
  0xd0   : > { %v620_v55 = vadd.f32 %v619_v45, %v618_v37  ;;  %v626_v56 = vadd.f32 %v625_v46, %v624_v38  ;;  %v606_v57 = vadd.f32 %v605_v47, %v604_v39  ;;  %v612_v58 = vadd.f32 %v611_v48, %v610_v40 }
  0xd1   : > { %v632_v59 = vadd.f32 %v631_v51, %v629_v41  ;;  %v638_v60 = vadd.f32 %v637_v52, %v630_v42  ;;  %v657_v61 = vmul.f32 %v1722_v53, %v1658_v3  ;;  %v658_v62 = vmul.f32 %v1726_v54, %v1656_v2 }
  0xd2   : > { %v621_v63 = vrot.slane %v620_v55, 1  ;;  %v627_v4 = vrot.slane %v626_v56, 1  ;;  %v607_v5 = vrot.slane %v606_v57, 1  ;;  %v613_v6 = vrot.slane %v612_v58, 1  ;;  %v275_v7 = vpop.permute.xlu1 %274  ;;  %v273_v8 = vpop.permute.xlu0 %272 }
  0xd3   : > { %v633_v9 = vrot.slane %v632_v59, 2  ;;  %v639_v11 = vrot.slane %v638_v60, 2  ;;  %v659_v12 = vrot.slane %v657_v61, 4  ;;  %v665_v13 = vrot.slane %v658_v62, 4 }
  0xd4   : > { %v1738_v24 = vadd.f32 %v621_v63, %v620_v55  ;;  %v1740_v25 = vadd.f32 %v627_v4, %v626_v56  ;;  %v1744_v26 = vsel %vm276_vm4, %v273_v8, %v275_v7  ;;  %v1748_v27 = vsel %vm276_vm4, %v275_v7, %v273_v8 }
  0xd5   : > { %v1734_v16 = vadd.f32 %v633_v9, %v632_v59  ;;  %v1736_v17 = vadd.f32 %v639_v11, %v638_v60  ;;  %v660_v18 = vadd.f32 %v659_v12, %v657_v61  ;;  %v666_v23 = vadd.f32 %v665_v13, %v658_v62 }
  0xd6   : > { %v282_v28 = vpop.permute.xlu1 %281  ;;  %v280_v29 = vpop.permute.xlu0 %279  ;;  %v1750_v30 = vadd.f32 %v607_v5, %v606_v57  ;;  %v1752_v31 = vadd.f32 %v613_v6, %v612_v58  ;;  %v671_v34 = vmul.f32 %v1744_v26, %v1658_v3  ;;  %v672_v37 = vmul.f32 %v1748_v27, %v1656_v2 }
  0xd7   : > { %v661_v32 = vrot.slane %v660_v18, 2  ;;  %v667_v33 = vrot.slane %v666_v23, 2  ;;  %v1760_v38 = vsel %vm283_vm6, %v280_v29, %v282_v28  ;;  %v1764_v39 = vsel %vm283_vm6, %v282_v28, %v280_v29 }
  0xd8   : > { %v635_v40 = vrot.slane %v1734_v16, 1  ;;  %v641_v41 = vrot.slane %v1736_v17, 1  ;;  %v673_v44 = vrot.slane %v671_v34, 4  ;;  %v679_v45 = vrot.slane %v672_v37, 4 }
  0xd9   : > { %v662_v42 = vadd.f32 %v661_v32, %v660_v18  ;;  %v668_v43 = vadd.f32 %v667_v33, %v666_v23  ;;  %v685_v46 = vmul.f32 %v1760_v38, %v1658_v3  ;;  %v686_v47 = vmul.f32 %v1764_v39, %v1656_v2 }
  0xda   : > { %v289_v48 = vpop.permute.xlu1 %288  ;;  %v287_v49 = vpop.permute.xlu0 %286  ;;  %v674_v56 = vadd.f32 %v673_v44, %v671_v34  ;;  %v680_v57 = vadd.f32 %v679_v45, %v672_v37 }
  0xdb   : > { %v663_v50 = vrot.slane %v662_v42, 1  ;;  %v669_v51 = vrot.slane %v668_v43, 1  ;;  %v1774_v52 = vsel %vm290_vm7, %v287_v49, %v289_v48  ;;  %v1778_v55 = vsel %vm290_vm7, %v289_v48, %v287_v49 }
  0xdc   : > { %v687_v58 = vrot.slane %v685_v46, 4  ;;  %v693_v3 = vrot.slane %v686_v47, 4  ;;  %v293_v2 = vmul.f32 %v1774_v52, %v1696_v22  ;;  %v294_v61 = vmul.f32 %v1778_v55, %v1694_v21 }
  0xdd   : > { %v664_v59 = vadd.f32 %v663_v50, %v662_v42  ;;  %v670_v60 = vadd.f32 %v669_v51, %v668_v43  ;;  %v675_v62 = vrot.slane %v674_v56, 2  ;;  %v681_v63 = vrot.slane %v680_v57, 2 }
  0xde   : > { %v688_v4 = vadd.f32 %v687_v58, %v685_v46  ;;  %v694_v5 = vadd.f32 %v693_v3, %v686_v47  ;;  %v295_v8 = vrot.slane %v293_v2, 4  ;;  %v301_v9 = vrot.slane %v294_v61, 4 }
  0xdf   : > { %v1077_v6 = vsel %vm1028_vm5, %v650_v14, %v664_v59  ;;  %v1078_v7 = vsel %vm1028_vm5, %v656_v15, %v670_v60  ;;  %v676_v11 = vadd.f32 %v675_v62, %v674_v56  ;;  %v682_v12 = vadd.f32 %v681_v63, %v680_v57 }
  0xe0   : > { %v689_v13 = vrot.slane %v688_v4, 2  ;;  %v695_v18 = vrot.slane %v694_v5, 2  ;;  %v296_v23 = vadd.f32 %v295_v8, %v293_v2  ;;  %v302_v28 = vadd.f32 %v301_v9, %v294_v61 }
  0xe1   : > { %v307_v29 = vmul.f32 %v1774_v52, %v1692_v20  ;;  %v308_v32 = vmul.f32 %v1778_v55, %v1690_v19  ;;  %v677_v33 = vrot.slane %v676_v11, 1  ;;  %v683_v34 = vrot.slane %v682_v12, 1 }
  0xe2   : > { %v690_v37 = vadd.f32 %v689_v13, %v688_v4  ;;  %v696_v14 = vadd.f32 %v695_v18, %v694_v5  ;;  %v297_v42 = vrot.slane %v296_v23, 2  ;;  %v303_v15 = vrot.slane %v302_v28, 2 }
  0xe3   : > { %v309_v43 = vrot.slane %v307_v29, 4  ;;  %v315_v44 = vrot.slane %v308_v32, 4  ;;  %v678_v45 = vadd.f32 %v677_v33, %v676_v11  ;;  %v684_v46 = vadd.f32 %v683_v34, %v682_v12 }
  0xe4   : > { %v691_v47 = vrot.slane %v690_v37, 1  ;;  %v697_v48 = vrot.slane %v696_v14, 1  ;;  %v298_v49 = vadd.f32 %v297_v42, %v296_v23  ;;  %v304_v50 = vadd.f32 %v303_v15, %v302_v28 }
  0xe5   : > { %v310_v51 = vadd.f32 %v309_v43, %v307_v29  ;;  %v316_v56 = vadd.f32 %v315_v44, %v308_v32  ;;  %v1791_v57 = vadd.f32 %v635_v40, %v1734_v16  ;;  %v1794_v58 = vadd.f32 %v641_v41, %v1736_v17 }
  0xe6   : > { %v1797_v3 = vsel %vm1031_vm8, %v1077_v6, %v678_v45  ;;  %v1800_v59 = vsel %vm1031_vm8, %v1078_v7, %v684_v46  ;;  %v299_v60 = vrot.slane %v298_v49, 1  ;;  %v305_v2 = vrot.slane %v304_v50, 1 }
  0xe7   : > { %v311_v61 = vrot.slane %v310_v51, 2  ;;  %v317_v62 = vrot.slane %v316_v56, 2  ;;  %v1802_v63 = vadd.f32 %v691_v47, %v690_v37  ;;  %v1804_v4 = vadd.f32 %v697_v48, %v696_v14 }
  0xe8   : > { %v321_v16 = vmul.f32 %v1774_v52, %v1712_v36  ;;  %v322_v17 = vmul.f32 %v1778_v55, %v1708_v35  ;;  %v1810_v40 = vadd.f32 %v299_v60, %v298_v49  ;;  %v1812_v41 = vadd.f32 %v305_v2, %v304_v50 }
  0xe9   : > { %v312_v5 = vadd.f32 %v311_v61, %v310_v51  ;;  %v318_v6 = vadd.f32 %v317_v62, %v316_v56  ;;  %v335_v9 = vmul.f32 %v1774_v52, %v1639_v0  ;;  %v336_v11 = vmul.f32 %v1778_v55, %v1644_v1 }
  0xea   : > { %v323_v7 = vrot.slane %v321_v16, 4  ;;  %v329_v8 = vrot.slane %v322_v17, 4  ;;  %v349_v18 = vmul.f32 %v1774_v52, %v1722_v53  ;;  %v350_v23 = vmul.f32 %v1778_v55, %v1726_v54 }
  0xeb   : > { %v313_v12 = vrot.slane %v312_v5, 1  ;;  %v319_v13 = vrot.slane %v318_v6, 1  ;;  %v337_v32 = vrot.slane %v335_v9, 4  ;;  %v343_v33 = vrot.slane %v336_v11, 4 }
  0xec   : > { %v324_v28 = vadd.f32 %v323_v7, %v321_v16  ;;  %v330_v29 = vadd.f32 %v329_v8, %v322_v17  ;;  %v351_v14 = vrot.slane %v349_v18, 4  ;;  %v357_v42 = vrot.slane %v350_v23, 4 }
  0xed   : > { %v314_v34 = vadd.f32 %v313_v12, %v312_v5  ;;  %v320_v37 = vadd.f32 %v319_v13, %v318_v6  ;;  %v338_v44 = vadd.f32 %v337_v32, %v335_v9  ;;  %v344_v45 = vadd.f32 %v343_v33, %v336_v11 }
  0xee   : > { %v325_v15 = vrot.slane %v324_v28, 2  ;;  %v331_v43 = vrot.slane %v330_v29, 2  ;;  %v352_v46 = vadd.f32 %v351_v14, %v349_v18  ;;  %v358_v47 = vadd.f32 %v357_v42, %v350_v23 }
  0xef   : > { %v363_v48 = vmul.f32 %v1774_v52, %v1744_v26  ;;  %v364_v49 = vmul.f32 %v1778_v55, %v1748_v27  ;;  %v339_v56 = vrot.slane %v338_v44, 2  ;;  %v345_v60 = vrot.slane %v344_v45, 2 }
  0xf0   : > { %v326_v50 = vadd.f32 %v325_v15, %v324_v28  ;;  %v332_v51 = vadd.f32 %v331_v43, %v330_v29  ;;  %v353_v2 = vrot.slane %v352_v46, 2  ;;  %v359_v61 = vrot.slane %v358_v47, 2 }
  0xf1   : > { %v365_v62 = vrot.slane %v363_v48, 4  ;;  %v371_v16 = vrot.slane %v364_v49, 4  ;;  %v340_v6 = vadd.f32 %v339_v56, %v338_v44  ;;  %v346_v7 = vadd.f32 %v345_v60, %v344_v45 }
  0xf2   : > { %v327_v17 = vrot.slane %v326_v50, 1  ;;  %v333_v5 = vrot.slane %v332_v51, 1  ;;  %v354_v8 = vadd.f32 %v353_v2, %v352_v46  ;;  %v360_v9 = vadd.f32 %v359_v61, %v358_v47 }
  0xf3   : > { %v366_v11 = vadd.f32 %v365_v62, %v363_v48  ;;  %v372_v12 = vadd.f32 %v371_v16, %v364_v49  ;;  %v341_v23 = vrot.slane %v340_v6, 1  ;;  %v347_v28 = vrot.slane %v346_v7, 1  ;;  %v392_v62 = vpop.permute.xlu0 %391 }
  0xf4   : > { %v328_v13 = vadd.f32 %v327_v17, %v326_v50  ;;  %v334_v18 = vadd.f32 %v333_v5, %v332_v51  ;;  %v355_v29 = vrot.slane %v354_v8, 1  ;;  %v361_v32 = vrot.slane %v360_v9, 1 }
  0xf5   : > { %v367_v33 = vrot.slane %v366_v11, 2  ;;  %v373_v14 = vrot.slane %v372_v12, 2  ;;  %v342_v42 = vadd.f32 %v341_v23, %v340_v6  ;;  %v348_v15 = vadd.f32 %v347_v28, %v346_v7 }
  0xf6   : > { %v377_v43 = vmul.f32 %v1774_v52, %v1760_v38  ;;  %v378_v44 = vmul.f32 %v1778_v55, %v1764_v39  ;;  %v356_v45 = vadd.f32 %v355_v29, %v354_v8  ;;  %v362_v46 = vadd.f32 %v361_v32, %v360_v9  ;;  %v394_v55 = vpop.permute.xlu1 %393 }
  0xf7   : > { %v368_v47 = vadd.f32 %v367_v33, %v366_v11  ;;  %v374_v48 = vadd.f32 %v373_v14, %v372_v12  ;;  %v1029_v51 = vsel %vm1028_vm5, %v1810_v40, %v314_v34  ;;  %v1030_v56 = vsel %vm1028_vm5, %v1812_v41, %v320_v37 }
  0xf8   : > { %v379_v49 = vrot.slane %v377_v43, 4  ;;  %v385_v50 = vrot.slane %v378_v44, 4  ;;  %v1032_v52 = vsel %vm1031_vm8, %v1029_v51, %v328_v13  ;;  %v1033_v61 = vsel %vm1031_vm8, %v1030_v56, %v334_v18 }
  0xf9   : > { %v369_v60 = vrot.slane %v368_v47, 1  ;;  %v375_v2 = vrot.slane %v374_v48, 1  ;;  %v1035_v5 = vsel %vm1034_vm10, %v1032_v52, %v342_v42  ;;  %v1036_v6 = vsel %vm1034_vm10, %v1033_v61, %v348_v15 }
  0xfa   : > { %v380_v16 = vadd.f32 %v379_v49, %v377_v43  ;;  %v386_v17 = vadd.f32 %v385_v50, %v378_v44  ;;  %v1038_v34 = vsel %vm1037_vm9, %v1035_v5, %v356_v45  ;;  %v1039_v41 = vsel %vm1037_vm9, %v1036_v6, %v362_v46 }
  0xfb   : > { %v370_v7 = vadd.f32 %v369_v60, %v368_v47  ;;  %v376_v40 = vadd.f32 %v375_v2, %v374_v48  ;;  %v1843_v9 = vsel %vm395_vm11, %v392_v62, %v394_v55  ;;  %v1847_v11 = vsel %vm395_vm11, %v394_v55, %v392_v62 }
  0xfc   : > { %v381_v37 = vrot.slane %v380_v16, 2  ;;  %v387_v8 = vrot.slane %v386_v17, 2  ;;  %v398_v18 = vmul.f32 %v1843_v9, %v1696_v22  ;;  %v399_v23 = vmul.f32 %v1847_v11, %v1694_v21 }
  0xfd   : > { %v1041_v12 = vsel %vm1040_vm12, %v1038_v34, %v370_v7  ;;  %v1042_v13 = vsel %vm1040_vm12, %v1039_v41, %v376_v40  ;;  %v412_v32 = vmul.f32 %v1843_v9, %v1692_v20  ;;  %v413_v33 = vmul.f32 %v1847_v11, %v1690_v19 }
  0xfe   : > { %v382_v28 = vadd.f32 %v381_v37, %v380_v16  ;;  %v388_v29 = vadd.f32 %v387_v8, %v386_v17  ;;  %v400_v14 = vrot.slane %v398_v18, 4  ;;  %v406_v42 = vrot.slane %v399_v23, 4 }
  0xff   : > { %v426_v15 = vmul.f32 %v1843_v9, %v1712_v36  ;;  %v427_v43 = vmul.f32 %v1847_v11, %v1708_v35  ;;  %v414_v46 = vrot.slane %v412_v32, 4  ;;  %v420_v47 = vrot.slane %v413_v33, 4 }
 0x100   : > { %v383_v44 = vrot.slane %v382_v28, 1  ;;  %v389_v45 = vrot.slane %v388_v29, 1  ;;  %v401_v48 = vadd.f32 %v400_v14, %v398_v18  ;;  %v407_v49 = vadd.f32 %v406_v42, %v399_v23 }
 0x101   : > { %v428_v50 = vrot.slane %v426_v15, 4  ;;  %v434_v51 = vrot.slane %v427_v43, 4  ;;  %v415_v2 = vadd.f32 %v414_v46, %v412_v32  ;;  %v421_v52 = vadd.f32 %v420_v47, %v413_v33 }
 0x102   : > { %v384_v56 = vadd.f32 %v383_v44, %v382_v28  ;;  %v390_v60 = vadd.f32 %v389_v45, %v388_v29  ;;  %v402_v61 = vrot.slane %v401_v48, 2  ;;  %v408_v55 = vrot.slane %v407_v49, 2 }
 0x103   : > { %v429_v62 = vadd.f32 %v428_v50, %v426_v15  ;;  %v435_v16 = vadd.f32 %v434_v51, %v427_v43  ;;  %v416_v6 = vrot.slane %v415_v2, 2  ;;  %v422_v7 = vrot.slane %v421_v52, 2 }
 0x104   : > { %v1864_v17 = vsel %vm1043_vm13, %v1041_v12, %v384_v56  ;;  %v1867_v5 = vsel %vm1043_vm13, %v1042_v13, %v390_v60  ;;  %v403_v40 = vadd.f32 %v402_v61, %v401_v48  ;;  %v409_v34 = vadd.f32 %v408_v55, %v407_v49 }
 0x105   : > { %v430_v41 = vrot.slane %v429_v62, 2  ;;  %v436_v37 = vrot.slane %v435_v16, 2  ;;  %v417_v8 = vadd.f32 %v416_v6, %v415_v2  ;;  %v423_v18 = vadd.f32 %v422_v7, %v421_v52 }
 0x106   : > { %v440_v23 = vmul.f32 %v1843_v9, %v1639_v0  ;;  %v441_v28 = vmul.f32 %v1847_v11, %v1644_v1  ;;  %v404_v29 = vrot.slane %v403_v40, 1  ;;  %v410_v12 = vrot.slane %v409_v34, 1 }
 0x107   : > { %v431_v32 = vadd.f32 %v430_v41, %v429_v62  ;;  %v437_v33 = vadd.f32 %v436_v37, %v435_v16  ;;  %v418_v13 = vrot.slane %v417_v8, 1  ;;  %v424_v14 = vrot.slane %v423_v18, 1 }
 0x108   : > { %v442_v42 = vrot.slane %v440_v23, 4  ;;  %v448_v15 = vrot.slane %v441_v28, 4  ;;  %v405_v43 = vadd.f32 %v404_v29, %v403_v40  ;;  %v411_v44 = vadd.f32 %v410_v12, %v409_v34 }
 0x109   : > { %v432_v45 = vrot.slane %v431_v32, 1  ;;  %v438_v46 = vrot.slane %v437_v33, 1  ;;  %v419_v47 = vadd.f32 %v418_v13, %v417_v8  ;;  %v425_v48 = vadd.f32 %v424_v14, %v423_v18 }
 0x10a   : > { %v443_v49 = vadd.f32 %v442_v42, %v440_v23  ;;  %v449_v50 = vadd.f32 %v448_v15, %v441_v28  ;;  %v454_v60 = vmul.f32 %v1843_v9, %v1722_v53  ;;  %v455_v2 = vmul.f32 %v1847_v11, %v1726_v54 }
 0x10b   : > { %v433_v51 = vadd.f32 %v432_v45, %v431_v32  ;;  %v439_v56 = vadd.f32 %v438_v46, %v437_v33  ;;  %v468_v55 = vmul.f32 %v1843_v9, %v1744_v26  ;;  %v469_v62 = vmul.f32 %v1847_v11, %v1748_v27 }
 0x10c   : > { %v444_v52 = vrot.slane %v443_v49, 2  ;;  %v450_v61 = vrot.slane %v449_v50, 2  ;;  %v456_v16 = vrot.slane %v454_v60, 4  ;;  %v462_v6 = vrot.slane %v455_v2, 4 }
 0x10d   : > { %v482_v7 = vmul.f32 %v1843_v9, %v1760_v38  ;;  %v483_v40 = vmul.f32 %v1847_v11, %v1764_v39  ;;  %v470_v37 = vrot.slane %v468_v55, 4  ;;  %v476_v8 = vrot.slane %v469_v62, 4 }
 0x10e   : > { %v445_v34 = vadd.f32 %v444_v52, %v443_v49  ;;  %v451_v41 = vadd.f32 %v450_v61, %v449_v50  ;;  %v457_v18 = vadd.f32 %v456_v16, %v454_v60  ;;  %v463_v23 = vadd.f32 %v462_v6, %v455_v2 }
 0x10f   : > { %v484_v28 = vrot.slane %v482_v7, 4  ;;  %v490_v29 = vrot.slane %v483_v40, 4  ;;  %v471_v33 = vadd.f32 %v470_v37, %v468_v55  ;;  %v477_v13 = vadd.f32 %v476_v8, %v469_v62 }
 0x110   : > { %v446_v12 = vrot.slane %v445_v34, 1  ;;  %v452_v32 = vrot.slane %v451_v41, 1  ;;  %v458_v14 = vrot.slane %v457_v18, 2  ;;  %v464_v42 = vrot.slane %v463_v23, 2 }
 0x111   : > { %v485_v9 = vadd.f32 %v484_v28, %v482_v7  ;;  %v491_v15 = vadd.f32 %v490_v29, %v483_v40  ;;  %v472_v46 = vrot.slane %v471_v33, 2  ;;  %v478_v49 = vrot.slane %v477_v13, 2 }
 0x112   : > { %v447_v45 = vadd.f32 %v446_v12, %v445_v34  ;;  %v453_v11 = vadd.f32 %v452_v32, %v451_v41  ;;  %v459_v50 = vadd.f32 %v458_v14, %v457_v18  ;;  %v465_v52 = vadd.f32 %v464_v42, %v463_v23 }
 0x113   : > { %v486_v60 = vrot.slane %v485_v9, 2  ;;  %v492_v2 = vrot.slane %v491_v15, 2  ;;  %v473_v61 = vadd.f32 %v472_v46, %v471_v33  ;;  %v479_v16 = vadd.f32 %v478_v49, %v477_v13  ;;  %v497_v33 = vpop.permute.xlu0 %496 }
 0x114   : > { %v1047_v55 = vsel %vm1046_vm14, %v1864_v17, %v405_v43  ;;  %v1048_v62 = vsel %vm1046_vm14, %v1867_v5, %v411_v44  ;;  %v460_v6 = vrot.slane %v459_v50, 1  ;;  %v466_v37 = vrot.slane %v465_v52, 1  ;;  %v499_v44 = vpop.permute.xlu1 %498 }
 0x115   : > { %v487_v7 = vadd.f32 %v486_v60, %v485_v9  ;;  %v493_v40 = vadd.f32 %v492_v2, %v491_v15  ;;  %v474_v34 = vrot.slane %v473_v61, 1  ;;  %v480_v41 = vrot.slane %v479_v16, 1  ;;  %1133 = vst [vmem:[%s1677_s18] sm:$0xff] %v1047_v55  ;;  %1134 = vst [vmem:[%s1677_s18 + $0x8] sm:$0xff] %v1048_v62 }
 0x116   : > { %v1049_v8 = vsel %vm1028_vm5, %v419_v47, %v433_v51  ;;  %v1050_v18 = vsel %vm1028_vm5, %v425_v48, %v439_v56  ;;  %v461_v23 = vadd.f32 %v460_v6, %v459_v50  ;;  %v467_v28 = vadd.f32 %v466_v37, %v465_v52 }
 0x117   : > { %v488_v29 = vrot.slane %v487_v7, 1  ;;  %v494_v12 = vrot.slane %v493_v40, 1  ;;  %v475_v32 = vadd.f32 %v474_v34, %v473_v61  ;;  %v481_v17 = vadd.f32 %v480_v41, %v479_v16 }
 0x118   : > { %v1051_v5 = vsel %vm1031_vm8, %v1049_v8, %v447_v45  ;;  %v1052_v43 = vsel %vm1031_vm8, %v1050_v18, %v453_v11  ;;  %v1906_v15 = vsel %vm500_vm15, %v497_v33, %v499_v44  ;;  %v1910_v45 = vsel %vm500_vm15, %v499_v44, %v497_v33 }
 0x119   : > { %v489_v13 = vadd.f32 %v488_v29, %v487_v7  ;;  %v495_v14 = vadd.f32 %v494_v12, %v493_v40  ;;  %v1053_v47 = vsel %vm1034_vm10, %v1051_v5, %v461_v23  ;;  %v1054_v48 = vsel %vm1034_vm10, %v1052_v43, %v467_v28 }
 0x11a   : > { %v1055_v51 = vsel %vm1037_vm9, %v1053_v47, %v475_v32  ;;  %v1056_v56 = vsel %vm1037_vm9, %v1054_v48, %v481_v17  ;;  %v503_v11 = vmul.f32 %v1906_v15, %v1696_v22  ;;  %v504_v46 = vmul.f32 %v1910_v45, %v1694_v21 }
 0x11b   : > { %v1899_v42 = vsel %vm1040_vm12, %v1055_v51, %v489_v13  ;;  %v1902_v9 = vsel %vm1040_vm12, %v1056_v56, %v495_v14  ;;  %v517_v49 = vmul.f32 %v1906_v15, %v1692_v20  ;;  %v518_v50 = vmul.f32 %v1910_v45, %v1690_v19 }
 0x11c   : > { %v531_v52 = vmul.f32 %v1906_v15, %v1712_v36  ;;  %v532_v60 = vmul.f32 %v1910_v45, %v1708_v35  ;;  %v545_v2 = vmul.f32 %v1906_v15, %v1639_v0  ;;  %v546_v61 = vmul.f32 %v1910_v45, %v1644_v1 }
 0x11d   : > { %v505_v16 = vrot.slane %v503_v11, 4  ;;  %v511_v55 = vrot.slane %v504_v46, 4  ;;  %v519_v62 = vrot.slane %v517_v49, 4  ;;  %v525_v6 = vrot.slane %v518_v50, 4 }
 0x11e   : > { %v533_v37 = vrot.slane %v531_v52, 4  ;;  %v539_v7 = vrot.slane %v532_v60, 4  ;;  %v547_v40 = vrot.slane %v545_v2, 4  ;;  %v553_v34 = vrot.slane %v546_v61, 4 }
 0x11f   : > { %v506_v41 = vadd.f32 %v505_v16, %v503_v11  ;;  %v512_v8 = vadd.f32 %v511_v55, %v504_v46  ;;  %v520_v18 = vadd.f32 %v519_v62, %v517_v49  ;;  %v526_v23 = vadd.f32 %v525_v6, %v518_v50 }
 0x120   : > { %v534_v28 = vadd.f32 %v533_v37, %v531_v52  ;;  %v540_v29 = vadd.f32 %v539_v7, %v532_v60  ;;  %v548_v12 = vadd.f32 %v547_v40, %v545_v2  ;;  %v554_v32 = vadd.f32 %v553_v34, %v546_v61 }
 0x121   : > { %v507_v0 = vrot.slane %v506_v41, 2  ;;  %v513_v17 = vrot.slane %v512_v8, 2  ;;  %v521_v5 = vrot.slane %v520_v18, 2  ;;  %v527_v1 = vrot.slane %v526_v23, 2 }
 0x122   : > { %v535_v43 = vrot.slane %v534_v28, 2  ;;  %v541_v44 = vrot.slane %v540_v29, 2  ;;  %v549_v33 = vrot.slane %v548_v12, 2  ;;  %v555_v13 = vrot.slane %v554_v32, 2 }
 0x123   : > { %v508_v14 = vadd.f32 %v507_v0, %v506_v41  ;;  %v514_v47 = vadd.f32 %v513_v17, %v512_v8  ;;  %v522_v48 = vadd.f32 %v521_v5, %v520_v18  ;;  %v528_v51 = vadd.f32 %v527_v1, %v526_v23 }
 0x124   : > { %v536_v56 = vadd.f32 %v535_v43, %v534_v28  ;;  %v542_v11 = vadd.f32 %v541_v44, %v540_v29  ;;  %v550_v46 = vadd.f32 %v549_v33, %v548_v12  ;;  %v556_v49 = vadd.f32 %v555_v13, %v554_v32 }
 0x125   : > { %v509_v50 = vrot.slane %v508_v14, 1  ;;  %v515_v52 = vrot.slane %v514_v47, 1  ;;  %v523_v60 = vrot.slane %v522_v48, 1  ;;  %v529_v2 = vrot.slane %v528_v51, 1 }
 0x126   : > { %v537_v61 = vrot.slane %v536_v56, 1  ;;  %v543_v16 = vrot.slane %v542_v11, 1  ;;  %v551_v55 = vrot.slane %v550_v46, 1  ;;  %v557_v62 = vrot.slane %v556_v49, 1 }
 0x127   : > { %v510_v6 = vadd.f32 %v509_v50, %v508_v14  ;;  %v516_v37 = vadd.f32 %v515_v52, %v514_v47  ;;  %v524_v7 = vadd.f32 %v523_v60, %v522_v48  ;;  %v530_v40 = vadd.f32 %v529_v2, %v528_v51  ;;  %v702_v2 = vpop.permute.xlu1 %701 }
 0x128   : > { %v538_v34 = vadd.f32 %v537_v61, %v536_v56  ;;  %v544_v41 = vadd.f32 %v543_v16, %v542_v11  ;;  %v552_v8 = vadd.f32 %v551_v55, %v550_v46  ;;  %v558_v18 = vadd.f32 %v557_v62, %v556_v49  ;;  %v700_v61 = vpop.permute.xlu0 %699 }
 0x129   : > { %v559_v23 = vmul.f32 %v1906_v15, %v1722_v53  ;;  %v560_v28 = vmul.f32 %v1910_v45, %v1726_v54  ;;  %v573_v29 = vmul.f32 %v1906_v15, %v1744_v26  ;;  %v574_v12 = vmul.f32 %v1910_v45, %v1748_v27 }
 0x12a   : > { %v587_v32 = vmul.f32 %v1906_v15, %v1760_v38  ;;  %v588_v0 = vmul.f32 %v1910_v45, %v1764_v39  ;;  %v1059_v17 = vsel %vm1043_vm13, %v1899_v42, %v510_v6  ;;  %v1060_v5 = vsel %vm1043_vm13, %v1902_v9, %v516_v37 }
 0x12b   : > { %v561_v1 = vrot.slane %v559_v23, 4  ;;  %v567_v43 = vrot.slane %v560_v28, 4  ;;  %v575_v44 = vrot.slane %v573_v29, 4  ;;  %v581_v33 = vrot.slane %v574_v12, 4 }
 0x12c   : > { %v589_v13 = vrot.slane %v587_v32, 4  ;;  %v595_v14 = vrot.slane %v588_v0, 4  ;;  %v1061_v47 = vsel %vm1046_vm14, %v1059_v17, %v524_v7  ;;  %v1062_v48 = vsel %vm1046_vm14, %v1060_v5, %v530_v40 }
 0x12d   : > { %v562_v15 = vadd.f32 %v561_v1, %v559_v23  ;;  %v568_v51 = vadd.f32 %v567_v43, %v560_v28  ;;  %v576_v56 = vadd.f32 %v575_v44, %v573_v29  ;;  %v582_v45 = vadd.f32 %v581_v33, %v574_v12  ;;  %1135 = vst [vmem:[%s1677_s18 + $0x10] sm:$0xff] %v1061_v47 }
 0x12e   : > { %v590_v11 = vadd.f32 %v589_v13, %v587_v32  ;;  %v596_v46 = vadd.f32 %v595_v14, %v588_v0  ;;  %v1063_v42 = vsel %vm1028_vm5, %v538_v34, %v552_v8  ;;  %v1064_v9 = vsel %vm1028_vm5, %v544_v41, %v558_v18  ;;  %1136 = vst [vmem:[%s1677_s18 + $0x18] sm:$0xff] %v1062_v48 }
 0x12f   : > { %v563_v49 = vrot.slane %v562_v15, 2  ;;  %v569_v50 = vrot.slane %v568_v51, 2  ;;  %v577_v52 = vrot.slane %v576_v56, 2  ;;  %v583_v60 = vrot.slane %v582_v45, 2 }
 0x130   : > { %v591_v16 = vrot.slane %v590_v11, 2  ;;  %v597_v55 = vrot.slane %v596_v46, 2  ;;  %v1955_v34 = vsel %vm703_vm0, %v700_v61, %v702_v2  ;;  %v1959_v41 = vsel %vm703_vm0, %v702_v2, %v700_v61 }
 0x131   : > { %v564_v62 = vadd.f32 %v563_v49, %v562_v15  ;;  %v570_v6 = vadd.f32 %v569_v50, %v568_v51  ;;  %v578_v37 = vadd.f32 %v577_v52, %v576_v56  ;;  %v584_v7 = vadd.f32 %v583_v60, %v582_v45 }
 0x132   : > { %v592_v40 = vadd.f32 %v591_v16, %v590_v11  ;;  %v598_v23 = vadd.f32 %v597_v55, %v596_v46  ;;  %v706_v0 = vmul.f32 %v1959_v41, %v1696_v22  ;;  %v707_v17 = vmul.f32 %v1955_v34, %v1694_v21 }
 0x133   : > { %v565_v8 = vrot.slane %v564_v62, 1  ;;  %v571_v18 = vrot.slane %v570_v6, 1  ;;  %v579_v28 = vrot.slane %v578_v37, 1  ;;  %v585_v29 = vrot.slane %v584_v7, 1 }
 0x134   : > { %v593_v12 = vrot.slane %v592_v40, 1  ;;  %v599_v32 = vrot.slane %v598_v23, 1  ;;  %v708_v14 = vrot.slane %v706_v0, 4  ;;  %v714_v47 = vrot.slane %v707_v17, 4 }
 0x135   : > { %v566_v5 = vadd.f32 %v565_v8, %v564_v62  ;;  %v572_v1 = vadd.f32 %v571_v18, %v570_v6  ;;  %v580_v43 = vadd.f32 %v579_v28, %v578_v37  ;;  %v586_v44 = vadd.f32 %v585_v29, %v584_v7 }
 0x136   : > { %v594_v33 = vadd.f32 %v593_v12, %v592_v40  ;;  %v600_v13 = vadd.f32 %v599_v32, %v598_v23  ;;  %v720_v51 = vmul.f32 %v1959_v41, %v1692_v20  ;;  %v721_v56 = vmul.f32 %v1955_v34, %v1690_v19  ;;  %v1994_v12 = vld [vmem:[%s1632_s29] sm:$0xff]  ;;  %v1999_v32 = vld [vmem:[%s1632_s29 + $0x8] sm:$0xff] }
 0x137   : > { %v1065_v48 = vsel %vm1031_vm8, %v1063_v42, %v566_v5  ;;  %v1066_v15 = vsel %vm1031_vm8, %v1064_v9, %v572_v1  ;;  %v709_v46 = vadd.f32 %v708_v14, %v706_v0  ;;  %v715_v49 = vadd.f32 %v714_v47, %v707_v17 }
 0x138   : > { %v1067_v45 = vsel %vm1034_vm10, %v1065_v48, %v580_v43  ;;  %v1068_v11 = vsel %vm1034_vm10, %v1066_v15, %v586_v44  ;;  %v722_v60 = vrot.slane %v720_v51, 4  ;;  %v728_v42 = vrot.slane %v721_v56, 4 }
 0x139   : > { %v1069_v50 = vsel %vm1037_vm9, %v1067_v45, %v594_v33  ;;  %v1070_v52 = vsel %vm1037_vm9, %v1068_v11, %v600_v13  ;;  %v710_v61 = vrot.slane %v709_v46, 2  ;;  %v716_v16 = vrot.slane %v715_v49, 2 }
 0x13a   : > { %v1071_v9 = vsel %vm1040_vm12, %v1069_v50, %v1750_v30  ;;  %v1072_v2 = vsel %vm1040_vm12, %v1070_v52, %v1752_v31  ;;  %v723_v6 = vadd.f32 %v722_v60, %v720_v51  ;;  %v729_v37 = vadd.f32 %v728_v42, %v721_v56 }
 0x13b   : > { %v1073_v55 = vsel %vm1043_vm13, %v1071_v9, %v1738_v24  ;;  %v1074_v62 = vsel %vm1043_vm13, %v1072_v2, %v1740_v25  ;;  %v711_v31 = vadd.f32 %v710_v61, %v709_v46  ;;  %v717_v40 = vadd.f32 %v716_v16, %v715_v49 }
 0x13c   : > { %v1075_v7 = vsel %vm1046_vm14, %v1073_v55, %v1791_v57  ;;  %v1076_v30 = vsel %vm1046_vm14, %v1074_v62, %v1794_v58  ;;  %v724_v23 = vrot.slane %v723_v6, 2  ;;  %v730_v8 = vrot.slane %v729_v37, 2 }
 0x13d   : > { %v712_v18 = vrot.slane %v711_v31, 1  ;;  %v718_v28 = vrot.slane %v717_v40, 1  ;;  %v734_v24 = vmul.f32 %v1959_v41, %v1712_v36  ;;  %v735_v25 = vmul.f32 %v1955_v34, %v1708_v35  ;;  %1137 = vst [vmem:[%s1677_s18 + $0x20] sm:$0xff] %v1075_v7  ;;  %1138 = vst [vmem:[%s1677_s18 + $0x28] sm:$0xff] %v1076_v30 }
 0x13e   : > { %v725_v29 = vadd.f32 %v724_v23, %v723_v6  ;;  %v731_v57 = vadd.f32 %v730_v8, %v729_v37  ;;  %v748_v58 = vmul.f32 %v1994_v12, %v1959_v41  ;;  %v749_v0 = vmul.f32 %v1999_v32, %v1955_v34 }
 0x13f   : > { %v1081_v17 = vsel %vm1034_vm10, %v1797_v3, %v1802_v63  ;;  %v1082_v5 = vsel %vm1034_vm10, %v1800_v59, %v1804_v4  ;;  %v736_v1 = vrot.slane %v734_v24, 4  ;;  %v742_v43 = vrot.slane %v735_v25, 4 }
 0x140   : > { %v713_v44 = vadd.f32 %v712_v18, %v711_v31  ;;  %v719_v33 = vadd.f32 %v718_v28, %v717_v40  ;;  %v750_v13 = vrot.slane %v748_v58, 4  ;;  %v756_v14 = vrot.slane %v749_v0, 4 }
 0x141   : > { %v737_v47 = vadd.f32 %v736_v1, %v734_v24  ;;  %v743_v48 = vadd.f32 %v742_v43, %v735_v25  ;;  %v762_v15 = vmul.f32 %v1959_v41, %v1722_v53  ;;  %v763_v51 = vmul.f32 %v1955_v34, %v1726_v54 }
 0x142   : > { %v726_v56 = vrot.slane %v725_v29, 1  ;;  %v732_v3 = vrot.slane %v731_v57, 1  ;;  %v751_v63 = vadd.f32 %v750_v13, %v748_v58  ;;  %v757_v45 = vadd.f32 %v756_v14, %v749_v0 }
 0x143   : > { %v738_v11 = vrot.slane %v737_v47, 2  ;;  %v744_v59 = vrot.slane %v743_v48, 2  ;;  %v764_v4 = vrot.slane %v762_v15, 4  ;;  %v770_v46 = vrot.slane %v763_v51, 4 }
 0x144   : > { %v752_v49 = vrot.slane %v751_v63, 2  ;;  %v758_v50 = vrot.slane %v757_v45, 2  ;;  %v776_v52 = vmul.f32 %v1959_v41, %v1744_v26  ;;  %v777_v60 = vmul.f32 %v1955_v34, %v1748_v27 }
 0x145   : > { %v739_v42 = vadd.f32 %v738_v11, %v737_v47  ;;  %v745_v9 = vadd.f32 %v744_v59, %v743_v48  ;;  %v765_v2 = vadd.f32 %v764_v4, %v762_v15  ;;  %v771_v61 = vadd.f32 %v770_v46, %v763_v51 }
 0x146   : > { %v753_v16 = vadd.f32 %v752_v49, %v751_v63  ;;  %v759_v55 = vadd.f32 %v758_v50, %v757_v45  ;;  %v778_v62 = vrot.slane %v776_v52, 4  ;;  %v784_v6 = vrot.slane %v777_v60, 4 }
 0x147   : > { %v740_v37 = vrot.slane %v739_v42, 1  ;;  %v746_v7 = vrot.slane %v745_v9, 1  ;;  %v766_v30 = vrot.slane %v765_v2, 2  ;;  %v772_v31 = vrot.slane %v771_v61, 2 }
 0x148   : > { %v727_v40 = vadd.f32 %v726_v56, %v725_v29  ;;  %v733_v23 = vadd.f32 %v732_v3, %v731_v57  ;;  %v779_v8 = vadd.f32 %v778_v62, %v776_v52  ;;  %v785_v18 = vadd.f32 %v784_v6, %v777_v60 }
 0x149   : > { %v754_v28 = vrot.slane %v753_v16, 1  ;;  %v760_v24 = vrot.slane %v759_v55, 1  ;;  %v767_v25 = vadd.f32 %v766_v30, %v765_v2  ;;  %v773_v58 = vadd.f32 %v772_v31, %v771_v61 }
 0x14a   : > { %v741_v0 = vadd.f32 %v740_v37, %v739_v42  ;;  %v747_v1 = vadd.f32 %v746_v7, %v745_v9  ;;  %v780_v43 = vrot.slane %v779_v8, 2  ;;  %v786_v13 = vrot.slane %v785_v18, 2 }
 0x14b   : > { %v768_v14 = vrot.slane %v767_v25, 1  ;;  %v774_v47 = vrot.slane %v773_v58, 1  ;;  %v790_v48 = vmul.f32 %v1959_v41, %v1760_v38  ;;  %v791_v15 = vmul.f32 %v1955_v34, %v1764_v39 }
 0x14c   : > { %v781_v29 = vadd.f32 %v780_v43, %v779_v8  ;;  %v787_v57 = vadd.f32 %v786_v13, %v785_v18  ;;  %v1083_v51 = vsel %vm1037_vm9, %v1081_v17, %v713_v44  ;;  %v1084_v56 = vsel %vm1037_vm9, %v1082_v5, %v719_v33  ;;  %v807_v17 = vpop.permute.xlu1 %806  ;;  %v805_v5 = vpop.permute.xlu0 %804 }
 0x14d   : > { %v755_v3 = vadd.f32 %v754_v28, %v753_v16  ;;  %v761_v63 = vadd.f32 %v760_v24, %v759_v55  ;;  %v792_v45 = vrot.slane %v790_v48, 4  ;;  %v798_v11 = vrot.slane %v791_v15, 4 }
 0x14e   : > { %v782_v59 = vrot.slane %v781_v29, 1  ;;  %v788_v4 = vrot.slane %v787_v57, 1  ;;  %v1085_v46 = vsel %vm1040_vm12, %v1083_v51, %v727_v40  ;;  %v1086_v49 = vsel %vm1040_vm12, %v1084_v56, %v733_v23 }
 0x14f   : > { %v793_v41 = vadd.f32 %v792_v45, %v790_v48  ;;  %v799_v50 = vadd.f32 %v798_v11, %v791_v15  ;;  %v1087_v34 = vsel %vm1043_vm13, %v1085_v46, %v741_v0  ;;  %v1088_v52 = vsel %vm1043_vm13, %v1086_v49, %v747_v1 }
 0x150   : > { %v769_v44 = vadd.f32 %v768_v14, %v767_v25  ;;  %v775_v33 = vadd.f32 %v774_v47, %v773_v58  ;;  %v1089_v60 = vsel %vm1046_vm14, %v1087_v34, %v755_v3  ;;  %v1090_v42 = vsel %vm1046_vm14, %v1088_v52, %v761_v63 }
 0x151   : > { %v794_v9 = vrot.slane %v793_v41, 2  ;;  %v800_v2 = vrot.slane %v799_v50, 2  ;;  %v783_v61 = vadd.f32 %v782_v59, %v781_v29  ;;  %v789_v16 = vadd.f32 %v788_v4, %v787_v57  ;;  %1139 = vst [vmem:[%s1677_s18 + $0x30] sm:$0xff] %v1089_v60  ;;  %1140 = vst [vmem:[%s1677_s18 + $0x38] sm:$0xff] %v1090_v42 }
 0x152   : > { %v2032_v55 = vsel %vm808_vm1, %v805_v5, %v807_v17  ;;  %v2036_v62 = vsel %vm808_vm1, %v807_v17, %v805_v5 }
 0x153   : > { %v795_v6 = vadd.f32 %v794_v9, %v793_v41  ;;  %v801_v37 = vadd.f32 %v800_v2, %v799_v50  ;;  %v811_v7 = vmul.f32 %v2036_v62, %v1696_v22  ;;  %v812_v30 = vmul.f32 %v2032_v55, %v1694_v21 }
 0x154   : > { %v825_v31 = vmul.f32 %v2036_v62, %v1692_v20  ;;  %v826_v40 = vmul.f32 %v2032_v55, %v1690_v19  ;;  %v839_v23 = vmul.f32 %v2036_v62, %v1712_v36  ;;  %v840_v8 = vmul.f32 %v2032_v55, %v1708_v35 }
 0x155   : > { %v796_v18 = vrot.slane %v795_v6, 1  ;;  %v802_v28 = vrot.slane %v801_v37, 1  ;;  %v813_v24 = vrot.slane %v811_v7, 4  ;;  %v819_v25 = vrot.slane %v812_v30, 4 }
 0x156   : > { %v827_v58 = vrot.slane %v825_v31, 4  ;;  %v833_v0 = vrot.slane %v826_v40, 4  ;;  %v841_v1 = vrot.slane %v839_v23, 4  ;;  %v847_v43 = vrot.slane %v840_v8, 4 }
 0x157   : > { %v1091_v13 = vsel %vm1028_vm5, %v769_v44, %v783_v61  ;;  %v1092_v14 = vsel %vm1028_vm5, %v775_v33, %v789_v16  ;;  %v814_v47 = vadd.f32 %v813_v24, %v811_v7  ;;  %v820_v48 = vadd.f32 %v819_v25, %v812_v30 }
 0x158   : > { %v828_v15 = vadd.f32 %v827_v58, %v825_v31  ;;  %v834_v29 = vadd.f32 %v833_v0, %v826_v40  ;;  %v842_v57 = vadd.f32 %v841_v1, %v839_v23  ;;  %v848_v51 = vadd.f32 %v847_v43, %v840_v8 }
 0x159   : > { %v797_v56 = vadd.f32 %v796_v18, %v795_v6  ;;  %v803_v3 = vadd.f32 %v802_v28, %v801_v37  ;;  %v815_v63 = vrot.slane %v814_v47, 2  ;;  %v821_v45 = vrot.slane %v820_v48, 2 }
 0x15a   : > { %v829_v11 = vrot.slane %v828_v15, 2  ;;  %v835_v59 = vrot.slane %v834_v29, 2  ;;  %v843_v4 = vrot.slane %v842_v57, 2  ;;  %v849_v46 = vrot.slane %v848_v51, 2 }
 0x15b   : > { %v816_v49 = vadd.f32 %v815_v63, %v814_v47  ;;  %v822_v41 = vadd.f32 %v821_v45, %v820_v48  ;;  %v853_v50 = vmul.f32 %v1994_v12, %v2036_v62  ;;  %v854_v34 = vmul.f32 %v1999_v32, %v2032_v55 }
 0x15c   : > { %v830_v52 = vadd.f32 %v829_v11, %v828_v15  ;;  %v836_v17 = vadd.f32 %v835_v59, %v834_v29  ;;  %v844_v5 = vadd.f32 %v843_v4, %v842_v57  ;;  %v850_v44 = vadd.f32 %v849_v46, %v848_v51 }
 0x15d   : > { %v817_v33 = vrot.slane %v816_v49, 1  ;;  %v823_v60 = vrot.slane %v822_v41, 1  ;;  %v855_v42 = vrot.slane %v853_v50, 4  ;;  %v861_v9 = vrot.slane %v854_v34, 4 }
 0x15e   : > { %v1093_v2 = vsel %vm1031_vm8, %v1091_v13, %v797_v56  ;;  %v1094_v61 = vsel %vm1031_vm8, %v1092_v14, %v803_v3  ;;  %v831_v16 = vrot.slane %v830_v52, 1  ;;  %v837_v6 = vrot.slane %v836_v17, 1 }
 0x15f   : > { %v845_v37 = vrot.slane %v844_v5, 1  ;;  %v851_v7 = vrot.slane %v850_v44, 1  ;;  %v856_v30 = vadd.f32 %v855_v42, %v853_v50  ;;  %v862_v31 = vadd.f32 %v861_v9, %v854_v34 }
 0x160   : > { %v818_v40 = vadd.f32 %v817_v33, %v816_v49  ;;  %v824_v23 = vadd.f32 %v823_v60, %v822_v41  ;;  %v832_v8 = vadd.f32 %v831_v16, %v830_v52  ;;  %v838_v18 = vadd.f32 %v837_v6, %v836_v17 }
 0x161   : > { %v857_v28 = vrot.slane %v856_v30, 2  ;;  %v863_v24 = vrot.slane %v862_v31, 2  ;;  %v867_v25 = vmul.f32 %v2036_v62, %v1722_v53  ;;  %v868_v58 = vmul.f32 %v2032_v55, %v1726_v54 }
 0x162   : > { %v881_v0 = vmul.f32 %v2036_v62, %v1744_v26  ;;  %v882_v1 = vmul.f32 %v2032_v55, %v1748_v27  ;;  %v895_v43 = vmul.f32 %v2036_v62, %v1760_v38  ;;  %v896_v13 = vmul.f32 %v2032_v55, %v1764_v39 }
 0x163   : > { %v858_v14 = vadd.f32 %v857_v28, %v856_v30  ;;  %v864_v47 = vadd.f32 %v863_v24, %v862_v31  ;;  %v869_v48 = vrot.slane %v867_v25, 4  ;;  %v875_v15 = vrot.slane %v868_v58, 4 }
 0x164   : > { %v883_v29 = vrot.slane %v881_v0, 4  ;;  %v889_v57 = vrot.slane %v882_v1, 4  ;;  %v897_v51 = vrot.slane %v895_v43, 4  ;;  %v903_v56 = vrot.slane %v896_v13, 4 }
 0x165   : > { %v846_v3 = vadd.f32 %v845_v37, %v844_v5  ;;  %v852_v63 = vadd.f32 %v851_v7, %v850_v44  ;;  %v870_v45 = vadd.f32 %v869_v48, %v867_v25  ;;  %v876_v11 = vadd.f32 %v875_v15, %v868_v58  ;;  %v912_v48 = vpop.permute.xlu1 %911  ;;  %v910_v15 = vpop.permute.xlu0 %909 }
 0x166   : > { %v884_v59 = vadd.f32 %v883_v29, %v881_v0  ;;  %v890_v4 = vadd.f32 %v889_v57, %v882_v1  ;;  %v898_v46 = vadd.f32 %v897_v51, %v895_v43  ;;  %v904_v49 = vadd.f32 %v903_v56, %v896_v13 }
 0x167   : > { %v859_v62 = vrot.slane %v858_v14, 1  ;;  %v865_v41 = vrot.slane %v864_v47, 1  ;;  %v871_v50 = vrot.slane %v870_v45, 2  ;;  %v877_v55 = vrot.slane %v876_v11, 2 }
 0x168   : > { %v885_v34 = vrot.slane %v884_v59, 2  ;;  %v891_v52 = vrot.slane %v890_v4, 2  ;;  %v899_v17 = vrot.slane %v898_v46, 2  ;;  %v905_v33 = vrot.slane %v904_v49, 2 }
 0x169   : > { %v872_v60 = vadd.f32 %v871_v50, %v870_v45  ;;  %v878_v42 = vadd.f32 %v877_v55, %v876_v11  ;;  %v1095_v9 = vsel %vm1034_vm10, %v1093_v2, %v818_v40  ;;  %v1096_v5 = vsel %vm1034_vm10, %v1094_v61, %v824_v23 }
 0x16a   : > { %v886_v44 = vadd.f32 %v885_v34, %v884_v59  ;;  %v892_v16 = vadd.f32 %v891_v52, %v890_v4  ;;  %v900_v6 = vadd.f32 %v899_v17, %v898_v46  ;;  %v906_v37 = vadd.f32 %v905_v33, %v904_v49 }
 0x16b   : > { %v873_v7 = vrot.slane %v872_v60, 1  ;;  %v879_v30 = vrot.slane %v878_v42, 1  ;;  %v1097_v31 = vsel %vm1037_vm9, %v1095_v9, %v832_v8  ;;  %v1098_v28 = vsel %vm1037_vm9, %v1096_v5, %v838_v18 }
 0x16c   : > { %v887_v24 = vrot.slane %v886_v44, 1  ;;  %v893_v25 = vrot.slane %v892_v16, 1  ;;  %v901_v58 = vrot.slane %v900_v6, 1  ;;  %v907_v0 = vrot.slane %v906_v37, 1 }
 0x16d   : > { %v860_v1 = vadd.f32 %v859_v62, %v858_v14  ;;  %v866_v43 = vadd.f32 %v865_v41, %v864_v47  ;;  %v1099_v2 = vsel %vm1040_vm12, %v1097_v31, %v846_v3  ;;  %v1100_v61 = vsel %vm1040_vm12, %v1098_v28, %v852_v63 }
 0x16e   : > { %v874_v40 = vadd.f32 %v873_v7, %v872_v60  ;;  %v880_v23 = vadd.f32 %v879_v30, %v878_v42  ;;  %v888_v13 = vadd.f32 %v887_v24, %v886_v44  ;;  %v894_v8 = vadd.f32 %v893_v25, %v892_v16 }
 0x16f   : > { %v1101_v18 = vsel %vm1043_vm13, %v1099_v2, %v860_v1  ;;  %v1102_v29 = vsel %vm1043_vm13, %v1100_v61, %v866_v43  ;;  %v902_v14 = vadd.f32 %v901_v58, %v900_v6  ;;  %v908_v47 = vadd.f32 %v907_v0, %v906_v37 }
 0x170   : > { %v1103_v57 = vsel %vm1046_vm14, %v1101_v18, %v874_v40  ;;  %v1104_v51 = vsel %vm1046_vm14, %v1102_v29, %v880_v23  ;;  %v2083_v56 = vsel %vm913_vm2, %v910_v15, %v912_v48  ;;  %v915_v3 = vsel %vm913_vm2, %v912_v48, %v910_v15 }
 0x171   : > { %v916_v63 = vmul.f32 %v915_v3, %v1696_v22  ;;  %v917_v45 = vmul.f32 %v2083_v56, %v1694_v21  ;;  %v930_v11 = vmul.f32 %v915_v3, %v1692_v20  ;;  %v931_v59 = vmul.f32 %v2083_v56, %v1690_v19  ;;  %1141 = vst [vmem:[%s1677_s18 + $0x40] sm:$0xff] %v1103_v57 }
 0x172   : > { %1142 = vst [vmem:[%s1677_s18 + $0x48] sm:$0xff] %v1104_v51  ;;  %v944_v10 = vmul.f32 %v915_v3, %v1712_v36  ;;  %v945_v4 = vmul.f32 %v2083_v56, %v1708_v35  ;;  %v958_v46 = vmul.f32 %v1994_v12, %v915_v3  ;;  %v959_v22 = vmul.f32 %v1999_v32, %v2083_v56 }
 0x173   : > { %v918_v49 = vrot.slane %v916_v63, 4  ;;  %v924_v62 = vrot.slane %v917_v45, 4  ;;  %v932_v21 = vrot.slane %v930_v11, 4  ;;  %v938_v41 = vrot.slane %v931_v59, 4 }
 0x174   : > { %v946_v20 = vrot.slane %v944_v10, 4  ;;  %v952_v50 = vrot.slane %v945_v4, 4  ;;  %v960_v55 = vrot.slane %v958_v46, 4  ;;  %v966_v19 = vrot.slane %v959_v22, 4 }
 0x175   : > { %v919_v34 = vadd.f32 %v918_v49, %v916_v63  ;;  %v925_v52 = vadd.f32 %v924_v62, %v917_v45  ;;  %v933_v17 = vadd.f32 %v932_v21, %v930_v11  ;;  %v939_v36 = vadd.f32 %v938_v41, %v931_v59 }
 0x176   : > { %v947_v33 = vadd.f32 %v946_v20, %v944_v10  ;;  %v953_v60 = vadd.f32 %v952_v50, %v945_v4  ;;  %v961_v35 = vadd.f32 %v960_v55, %v958_v46  ;;  %v967_v42 = vadd.f32 %v966_v19, %v959_v22 }
 0x177   : > { %v920_v12 = vrot.slane %v919_v34, 2  ;;  %v926_v9 = vrot.slane %v925_v52, 2  ;;  %v934_v5 = vrot.slane %v933_v17, 2  ;;  %v940_v32 = vrot.slane %v939_v36, 2 }
 0x178   : > { %v948_v44 = vrot.slane %v947_v33, 2  ;;  %v954_v16 = vrot.slane %v953_v60, 2  ;;  %v962_v6 = vrot.slane %v961_v35, 2  ;;  %v968_v37 = vrot.slane %v967_v42, 2 }
 0x179   : > { %v921_v7 = vadd.f32 %v920_v12, %v919_v34  ;;  %v927_v30 = vadd.f32 %v926_v9, %v925_v52  ;;  %v935_v31 = vadd.f32 %v934_v5, %v933_v17  ;;  %v941_v28 = vadd.f32 %v940_v32, %v939_v36 }
 0x17a   : > { %v949_v24 = vadd.f32 %v948_v44, %v947_v33  ;;  %v955_v25 = vadd.f32 %v954_v16, %v953_v60  ;;  %v963_v58 = vadd.f32 %v962_v6, %v961_v35  ;;  %v969_v0 = vadd.f32 %v968_v37, %v967_v42 }
 0x17b   : > { %v922_v1 = vrot.slane %v921_v7, 1  ;;  %v928_v43 = vrot.slane %v927_v30, 1  ;;  %v936_v2 = vrot.slane %v935_v31, 1  ;;  %v942_v61 = vrot.slane %v941_v28, 1 }
 0x17c   : > { %v1105_v40 = vsel %vm1028_vm5, %v888_v13, %v902_v14  ;;  %v1106_v23 = vsel %vm1028_vm5, %v894_v8, %v908_v47  ;;  %v950_v18 = vrot.slane %v949_v24, 1  ;;  %v956_v29 = vrot.slane %v955_v25, 1 }
 0x17d   : > { %v923_v48 = vadd.f32 %v922_v1, %v921_v7  ;;  %v929_v15 = vadd.f32 %v928_v43, %v927_v30  ;;  %v937_v57 = vadd.f32 %v936_v2, %v935_v31  ;;  %v943_v51 = vadd.f32 %v942_v61, %v941_v28 }
 0x17e   : > { %v964_v63 = vrot.slane %v963_v58, 1  ;;  %v970_v45 = vrot.slane %v969_v0, 1  ;;  %v972_v11 = vmul.f32 %v915_v3, %v1722_v53  ;;  %v973_v59 = vmul.f32 %v2083_v56, %v1726_v54 }
 0x17f   : > { %v986_v10 = vmul.f32 %v915_v3, %v1744_v26  ;;  %v987_v13 = vmul.f32 %v2083_v56, %v1748_v27  ;;  %v1000_v8 = vmul.f32 %v915_v3, %v1760_v38  ;;  %v1001_v14 = vmul.f32 %v2083_v56, %v1764_v39 }
 0x180   : > { %v1107_v47 = vsel %vm1031_vm8, %v1105_v40, %v923_v48  ;;  %v1108_v4 = vsel %vm1031_vm8, %v1106_v23, %v929_v15  ;;  %v974_v46 = vrot.slane %v972_v11, 4  ;;  %v980_v22 = vrot.slane %v973_v59, 4 }
 0x181   : > { %v988_v53 = vrot.slane %v986_v10, 4  ;;  %v994_v49 = vrot.slane %v987_v13, 4  ;;  %v1002_v62 = vrot.slane %v1000_v8, 4  ;;  %v1008_v54 = vrot.slane %v1001_v14, 4 }
 0x182   : > { %v1109_v26 = vsel %vm1034_vm10, %v1107_v47, %v937_v57  ;;  %v1110_v21 = vsel %vm1034_vm10, %v1108_v4, %v943_v51  ;;  %v975_v27 = vadd.f32 %v974_v46, %v972_v11  ;;  %v981_v41 = vadd.f32 %v980_v22, %v973_v59 }
 0x183   : > { %v989_v38 = vadd.f32 %v988_v53, %v986_v10  ;;  %v995_v3 = vadd.f32 %v994_v49, %v987_v13  ;;  %v951_v20 = vadd.f32 %v950_v18, %v949_v24  ;;  %v957_v39 = vadd.f32 %v956_v29, %v955_v25 }
 0x184   : > { %v1003_v56 = vadd.f32 %v1002_v62, %v1000_v8  ;;  %v1009_v50 = vadd.f32 %v1008_v54, %v1001_v14  ;;  %v976_v55 = vrot.slane %v975_v27, 2  ;;  %v982_v19 = vrot.slane %v981_v41, 2 }
 0x185   : > { %v990_v34 = vrot.slane %v989_v38, 2  ;;  %v996_v52 = vrot.slane %v995_v3, 2  ;;  %v1111_v33 = vsel %vm1037_vm9, %v1109_v26, %v951_v20  ;;  %v1112_v60 = vsel %vm1037_vm9, %v1110_v21, %v957_v39 }
 0x186   : > { %v1004_v17 = vrot.slane %v1003_v56, 2  ;;  %v1010_v36 = vrot.slane %v1009_v50, 2  ;;  %v977_v35 = vadd.f32 %v976_v55, %v975_v27  ;;  %v983_v42 = vadd.f32 %v982_v19, %v981_v41 }
 0x187   : > { %v991_v12 = vadd.f32 %v990_v34, %v989_v38  ;;  %v997_v9 = vadd.f32 %v996_v52, %v995_v3  ;;  %v965_v5 = vadd.f32 %v964_v63, %v963_v58  ;;  %v971_v32 = vadd.f32 %v970_v45, %v969_v0  ;;  %v1026_v58 = vld [vmem:[%s1677_s18 + $0x60] sm:$0x1]  ;;  %v1027_v0 = vld [vmem:[%s1677_s18 + $0x68] sm:$0x1] }
 0x188   : > { %v1005_v44 = vadd.f32 %v1004_v17, %v1003_v56  ;;  %v1011_v16 = vadd.f32 %v1010_v36, %v1009_v50  ;;  %v978_v6 = vrot.slane %v977_v35, 1  ;;  %v984_v37 = vrot.slane %v983_v42, 1 }
 0x189   : > { %v992_v7 = vrot.slane %v991_v12, 1  ;;  %v998_v30 = vrot.slane %v997_v9, 1  ;;  %v1113_v24 = vsel %vm1040_vm12, %v1111_v33, %v965_v5  ;;  %v1114_v25 = vsel %vm1040_vm12, %v1112_v60, %v971_v32 }
 0x18a   : > { %v1006_v31 = vrot.slane %v1005_v44, 1  ;;  %v1012_v28 = vrot.slane %v1011_v16, 1  ;;  %v979_v1 = vadd.f32 %v978_v6, %v977_v35  ;;  %v985_v43 = vadd.f32 %v984_v37, %v983_v42 }
 0x18b   : > { %v993_v2 = vadd.f32 %v992_v7, %v991_v12  ;;  %v999_v61 = vadd.f32 %v998_v30, %v997_v9 }
 0x18c   : > { %v1007_v40 = vadd.f32 %v1006_v31, %v1005_v44  ;;  %v1013_v23 = vadd.f32 %v1012_v28, %v1011_v16  ;;  %v1115_v48 = vsel %vm1043_vm13, %v1113_v24, %v979_v1  ;;  %v1116_v15 = vsel %vm1043_vm13, %v1114_v25, %v985_v43 }
 0x18d   : > { %v1117_v18 = vsel %vm1046_vm14, %v1115_v48, %v993_v2  ;;  %v1118_v29 = vsel %vm1046_vm14, %v1116_v15, %v999_v61 }
 0x18e   : > { %v1131_v57 = vadd.f32 %v1026_v58, %v1007_v40  ;;  %v1132_v51 = vadd.f32 %v1027_v0, %v1013_v23  ;;  %1143 = vst [vmem:[%s1677_s18 + $0x50] sm:$0xff] %v1117_v18  ;;  %1144 = vst [vmem:[%s1677_s18 + $0x58] sm:$0xff] %v1118_v29 }
 0x190   : > { %1145 = vst [vmem:[%s1677_s18 + $0x60] sm:$0x1] %v1131_v57  ;;  %1146 = vst [vmem:[%s1677_s18 + $0x68] sm:$0x1] %v1132_v51 }
 0x191 PF: > { %s18_s14 = sadd.s32 1, %s1455_s14   ;;  %s2158_s9 = smov %s1439_s10 }
 0x192   : > { %p15_p9 = scmp.ge.s32.totalorder %s18_s14, 4   ;;  %s2159_s10 = smov %s1443_s11 }
 0x193   : > { %s2160_s11 = smov %s1536_s21  ;;  %s2161_s12 = smov %s1451_s13 }
 0x194   : > { %s2162_s13 = smov %s2164_s16  ;;  %17 = sbr.rel (!%p15_p9) target bundleno = 6 (0x6), region = 85 }
 0x19b   :  { %1168 = vsyncpa [#allocation3], 1 }
 0x19c   :  { %1170 = vsyncpa [#allocation3 + $0x1], 1 }
 0x19d   :  { %1171 = vsyncpa [#allocation5], 1 }
 0x19e   :  { %1173 = vsyncpa [#allocation5 + $0x1], 1 }

</bundles_post_ra>
